<compile_context>
chip_gen: v7x
topology: tpu7x:2x2x1
jax: 0.10.0
libtpu: 0.0.40
codegen_flags: <defaults>
</compile_context>

<pallas_src>
import functools

import jax
import jax.numpy as jnp
from jax import lax
from jax.experimental import pallas as pl
from jax.experimental.pallas import tpu as pltpu

_EPS = 1e-5


# ---------------------------------------------------------------------------
# Kernels
# ---------------------------------------------------------------------------
def _conv_stats_kernel(x_ref, w_ref, scale_ref, shift_ref, *out_refs,
                       apply_act, write_y, valid_cols, tile_cols):
    """One (C, T) tile: fused prev-BN apply + ReLU (optional), 1x1 conv as W @ X,
    one-pass BN sufficient statistics accumulated per grid-0 (batch) index."""
    if write_y:
        y_ref, sum_ref, sq_ref = out_refs
    else:
        sum_ref, sq_ref = out_refs

    # Per-i partial accumulators: (re)initialize at the start of every j-sweep.
    @pl.when(pl.program_id(1) == 0)
    def _init():
        sum_ref[...] = jnp.zeros_like(sum_ref)
        sq_ref[...] = jnp.zeros_like(sq_ref)

    x = x_ref[...]                                                  # (C, T) f32
    if apply_act:
        # previous layer's BatchNorm folded to per-channel scale/shift, then ReLU
        x = jnp.maximum(x * scale_ref[...] + shift_ref[...], 0.0)
        if valid_cols is not None:
            # zero padded lanes so they contribute nothing to the matmul / stats
            col = pl.program_id(1) * tile_cols + lax.broadcasted_iota(
                jnp.int32, x.shape, 1)
            x = jnp.where(col < valid_cols, x, 0.0)

    y = jnp.dot(w_ref[...], x, preferred_element_type=jnp.float32)  # (C, T) on MXU
    if write_y:
        y_ref[...] = y

    # one-pass stats: sum(y), sum(y*y) per channel (lane reduce -> XLU, keepdims)
    sum_ref[...] += jnp.sum(y, axis=1, keepdims=True)
    sq_ref[...] += jnp.sum(y * y, axis=1, keepdims=True)


def _final_kernel(y2_ref, w_ref, sc2_ref, sh2_ref, sc3_ref, sh3_ref, o_ref):
    """Recompute Y3 = W3 @ relu(BN2(Y2)) in-kernel and apply the affine-free BN3."""
    x = jnp.maximum(y2_ref[...] * sc2_ref[...] + sh2_ref[...], 0.0)
    y = jnp.dot(w_ref[...], x, preferred_element_type=jnp.float32)
    o_ref[...] = y * sc3_ref[...] + sh3_ref[...]


# ---------------------------------------------------------------------------
# Tiling / VMEM helpers
# ---------------------------------------------------------------------------
def _round_up(x, m):
    return ((x + m - 1) // m) * m


def _pick_tile(hw_padded, c):
    """Largest multiple-of-128 divisor of hw_padded within a ~4 MiB f32 (C,T) tile."""
    target = max(128, ((1 << 20) // max(c, 1)) // 128 * 128)   # ~4 MiB of f32 per tile
    if hw_padded <= target:
        return hw_padded
    best = 128
    t = 128
    while t <= target:
        if hw_padded % t == 0:
            best = t
        t += 128
    return best


def _vmem_limit(c, t):
    """Generation-aware VMEM cap (64 MiB/TC on v7x vs 128 MiB on v5e/v6e)."""
    try:
        phys = pltpu.get_tpu_info().vmem_capacity_bytes
    except Exception:
        phys = 64 * 1024 * 1024                                # conservative (v7x) fallback
    cap = int(phys * 0.6)                                      # leave compiler headroom
    # streamed x & y tiles double-buffered, weights (x2), small vectors, headroom
    est = 2 * 2 * (c * t * 4) + 2 * (c * c * 4) + (4 << 20)
    return int(min(cap, max(est, 32 * 1024 * 1024)))


def _weight_spec(c):
    if c >= 1024:
        # Don't double-buffer the grid-resident (C,C) weight at large C: frees VMEM
        # for bigger streamed activation tiles (matters most on v7x's 64 MiB VMEM).
        return pl.BlockSpec((c, c), lambda i, j: (0, 0), pipeline_mode=pl.Buffered(1))
    return pl.BlockSpec((c, c), lambda i, j: (0, 0))


# ---------------------------------------------------------------------------
# Pass wrappers
# ---------------------------------------------------------------------------
def _conv_stats_pass(x3, wmat, scale, shift, *, apply_act, write_y, t,
                     valid_cols, donate_x):
    n, c, hwp = x3.shape
    grid = (n, hwp // t)
    kernel = functools.partial(_conv_stats_kernel, apply_act=apply_act,
                               write_y=write_y, valid_cols=valid_cols, tile_cols=t)

    act_spec = pl.BlockSpec((None, c, t), lambda i, j: (i, 0, j))
    vec_spec = pl.BlockSpec((c, 1), lambda i, j: (0, 0))
    stat_spec = pl.BlockSpec((None, c, 1), lambda i, j: (i, 0, 0))
    stat_shape = jax.ShapeDtypeStruct((n, c, 1), jnp.float32)

    if write_y:
        out_specs = (act_spec, stat_spec, stat_spec)
        out_shape = (jax.ShapeDtypeStruct((n, c, hwp), jnp.float32),
                     stat_shape, stat_shape)
    else:
        out_specs = (stat_spec, stat_spec)
        out_shape = (stat_shape, stat_shape)

    flops = 2 * n * hwp * c * c + 6 * n * c * hwp
    bytes_accessed = (2 if write_y else 1) * n * c * hwp * 4 + c * c * 4

    return pl.pallas_call(
        kernel,
        grid=grid,
        in_specs=[act_spec, _weight_spec(c), vec_spec, vec_spec],
        out_specs=out_specs,
        out_shape=out_shape,
        # donate the streamed input buffer into the streamed output (same shape/dtype)
        input_output_aliases=({0: 0} if (donate_x and write_y) else {}),
        compiler_params=pltpu.CompilerParams(
            # batch axis 'parallel' (v7x megacore); j is the stats-accumulation axis
            dimension_semantics=("parallel", "arbitrary"),
            vmem_limit_bytes=_vmem_limit(c, t),
        ),
        cost_estimate=pl.CostEstimate(
            flops=flops, transcendentals=0, bytes_accessed=bytes_accessed),
    )(x3, wmat, scale, shift)


def _final_pass(y2, wmat, sc2, sh2, sc3, sh3, *, t):
    n, c, hwp = y2.shape
    grid = (n, hwp // t)
    act_spec = pl.BlockSpec((None, c, t), lambda i, j: (i, 0, j))
    vec_spec = pl.BlockSpec((c, 1), lambda i, j: (0, 0))
    return pl.pallas_call(
        _final_kernel,
        grid=grid,
        in_specs=[act_spec, _weight_spec(c), vec_spec, vec_spec, vec_spec, vec_spec],
        out_specs=act_spec,
        out_shape=jax.ShapeDtypeStruct((n, c, hwp), jnp.float32),
        input_output_aliases={0: 0},                        # Y2 is dead after this pass
        compiler_params=pltpu.CompilerParams(
            dimension_semantics=("parallel", "parallel"),   # no accumulators
            vmem_limit_bytes=_vmem_limit(c, t),
        ),
        cost_estimate=pl.CostEstimate(
            flops=2 * n * hwp * c * c + 4 * n * c * hwp, transcendentals=0,
            bytes_accessed=2 * n * c * hwp * 4 + c * c * 4),
    )(y2, wmat, sc2, sh2, sc3, sh3)


def _fold_bn(s_parts, q_parts, m, gamma, beta):
    """Reduce per-batch-index partial sums, fold BN (biased var, eps) to scale/shift."""
    s = jnp.sum(s_parts, axis=0)            # (C, 1)
    q = jnp.sum(q_parts, axis=0)
    mu = s / m
    var = jnp.maximum(q / m - mu * mu, 0.0)
    inv = lax.rsqrt(var + _EPS)
    if gamma is None:
        return inv, -mu * inv
    scale = gamma.reshape(-1, 1) * inv
    shift = beta.reshape(-1, 1) - mu * scale
    return scale, shift


# ---------------------------------------------------------------------------
# Full forward
# ---------------------------------------------------------------------------
def projector_c_forward(x_nchw, params):
    """x_nchw: (N, C, H, W) float32.  Returns (N, C, H, W) float32 (training-mode BN)."""
    n, c, h, w = x_nchw.shape
    hw = h * w
    m = n * hw

    hwp = _round_up(hw, 128)
    t = _pick_tile(hwp, c)

    x3 = x_nchw.reshape(n, c, hw).astype(jnp.float32)      # free reshape, no transpose
    if hwp != hw:
        # zero padding -> padded columns contribute 0 to pass-1 stats; later passes
        # mask the padded lanes after the (nonlinear) ReLU.
        x3 = jnp.pad(x3, ((0, 0), (0, 0), (0, hwp - hw)))
    valid = hw if hwp != hw else None

    w1, g1, b1, w2, g2, b2, w3, bias3 = params
    w1m = w1[:, :, 0, 0].astype(jnp.float32)               # (Cout, Cin)
    w2m = w2[:, :, 0, 0].astype(jnp.float32)
    w3m = w3[:, :, 0, 0].astype(jnp.float32)
    # conv3 bias: a per-channel constant cancels exactly under the final BatchNorm
    # because BN3 is affine-free and uses batch statistics over the same (N,H,W) set.
    del bias3

    ones = jnp.ones((c, 1), jnp.float32)
    zeros = jnp.zeros((c, 1), jnp.float32)

    # pass 1: Y1 = W1 @ X, per-i BN1 stats
    y1, s1, q1 = _conv_stats_pass(x3, w1m, ones, zeros, apply_act=False,
                                  write_y=True, t=t, valid_cols=None, donate_x=False)
    sc1, sh1 = _fold_bn(s1, q1, m, g1, b1)
    # pass 2: Y2 = W2 @ relu(BN1(Y1)), per-i BN2 stats  (Y1 buffer donated into Y2)
    y2, s2, q2 = _conv_stats_pass(y1, w2m, sc1, sh1, apply_act=True,
                                  write_y=True, t=t, valid_cols=valid, donate_x=True)
    sc2, sh2 = _fold_bn(s2, q2, m, g2, b2)
    # pass 3: stats-only for BN3 -- Y3 is never written to HBM
    s3, q3 = _conv_stats_pass(y2, w3m, sc2, sh2, apply_act=True,
                              write_y=False, t=t, valid_cols=valid, donate_x=False)
    sc3, sh3 = _fold_bn(s3, q3, m, None, None)
    # final fused pass: Out = BN3(W3 @ relu(BN2(Y2)))  (Y2 buffer donated into Out)
    out3 = _final_pass(y2, w3m, sc2, sh2, sc3, sh3, t=t)

    if hwp != hw:
        out3 = out3[:, :, :hw]
    return out3.reshape(n, c, h, w)


# ---------------------------------------------------------------------------
# Pure-jnp reference (includes conv3 bias, which must cancel in the output)
# ---------------------------------------------------------------------------
def _reference_forward(x_nchw, params):
    n, c, h, w = x_nchw.shape
    x = x_nchw.reshape(n, c, h * w).astype(jnp.float32)
    w1, g1, b1, w2, g2, b2, w3, bias3 = params

    def conv1x1(x3, wmat, bias=None):
        y = jnp.einsum('oc,ncl->nol', wmat, x3)
        if bias is not None:
            y = y + bias[None, :, None]
        return y

    def bn(y, gamma=None, beta=None):
        mu = jnp.mean(y, axis=(0, 2), keepdims=True)
        var = jnp.mean((y - mu) ** 2, axis=(0, 2), keepdims=True)
        yh = (y - mu) / jnp.sqrt(var + _EPS)
        if gamma is not None:
            yh = yh * gamma[None, :, None] + beta[None, :, None]
        return yh

    y = jnp.maximum(bn(conv1x1(x, w1[:, :, 0, 0]), g1, b1), 0.0)
    y = jnp.maximum(bn(conv1x1(y, w2[:, :, 0, 0]), g2, b2), 0.0)
    y = bn(conv1x1(y, w3[:, :, 0, 0], bias3))
    return y.reshape(n, c, h, w)


def init_params(key, feature_num):
    c = feature_num
    k1, k2, k3, k4 = jax.random.split(key, 4)
    scale = 1.0 / jnp.sqrt(jnp.float32(c))  # ~ PyTorch conv default fan-in scale
    w1 = jax.random.uniform(k1, (c, c, 1, 1), jnp.float32, -scale, scale)
    w2 = jax.random.uniform(k2, (c, c, 1, 1), jnp.float32, -scale, scale)
    w3 = jax.random.uniform(k3, (c, c, 1, 1), jnp.float32, -scale, scale)
    bias3 = jax.random.uniform(k4, (c,), jnp.float32, -scale, scale)
    g1 = jnp.ones((c,), jnp.float32)
    b1 = jnp.zeros((c,), jnp.float32)
    g2 = jnp.ones((c,), jnp.float32)
    b2 = jnp.zeros((c,), jnp.float32)
    return (w1, g1, b1, w2, g2, b2, w3, bias3)


if __name__ == "__main__":
    key = jax.random.PRNGKey(0)
    kx, kp = jax.random.split(key)

    batch, feature_num, spatial = 2, 32, 16
    x = jax.random.normal(kx, (batch, feature_num, spatial, spatial), jnp.float32)
    params = init_params(kp, feature_num)

    fwd = jax.jit(projector_c_forward)
    out = jax.block_until_ready(fwd(x, params))

    ref = _reference_forward(x, params)
    assert out.shape == (batch, feature_num, spatial, spatial)
    assert jnp.allclose(out, ref, atol=1e-4, rtol=1e-4), "mismatch vs jnp reference"

    print("KERNEL_OK")
</pallas_src>

<mosaic_0001>
module attributes {stable_mosaic.version = 11 : i64} {
  func.func @_conv_stats_kernel(%arg0: i32, %arg1: i32, %arg2: memref<1x32x256xf32, #tpu.memory_space<vmem>>, %arg3: memref<32x32xf32, #tpu.memory_space<vmem>>, %arg4: memref<32x1xf32, #tpu.memory_space<vmem>>, %arg5: memref<32x1xf32, #tpu.memory_space<vmem>>, %arg6: memref<1x32x256xf32, #tpu.memory_space<vmem>>, %arg7: memref<1x32x1xf32, #tpu.memory_space<vmem>>, %arg8: memref<1x32x1xf32, #tpu.memory_space<vmem>>) attributes {dimension_semantics = [#tpu.dimension_semantics<parallel>, #tpu.dimension_semantics<arbitrary>], iteration_bounds = array<i64: 2, 1>, scalar_prefetch = 0 : i64, scratch_operands = 0 : i64, tpu.core_type = #tpu.core_type<tc>, window_params = [{transform_indices = @transform_0, window_bounds = array<i64: 1, 32, 256>}, {pipeline_mode = #tpu.pipeline_mode<synchronous>, transform_indices = @transform_1, window_bounds = array<i64: 32, 32>}, {pipeline_mode = #tpu.pipeline_mode<synchronous>, transform_indices = @transform_2, window_bounds = array<i64: 32, 1>}, {pipeline_mode = #tpu.pipeline_mode<synchronous>, transform_indices = @transform_3, window_bounds = array<i64: 32, 1>}, {transform_indices = @transform_4, window_bounds = array<i64: 1, 32, 256>}, {transform_indices = @transform_5, window_bounds = array<i64: 1, 32, 1>}, {transform_indices = @transform_6, window_bounds = array<i64: 1, 32, 1>}]} {
    %c0_i32 = arith.constant 0 : i32
    %0 = arith.cmpi eq, %arg1, %c0_i32 : i32
    %1 = arith.extui %0 : i1 to i32
    %c0_i32_0 = arith.constant 0 : i32
    %2 = arith.cmpi ne, %1, %c0_i32_0 : i32
    scf.if %2 {
      %cst_22 = arith.constant 0.000000e+00 : f32
      %27 = vector.broadcast %cst_22 : f32 to vector<32x1xf32>
      %c0_23 = arith.constant 0 : index
      %c0_24 = arith.constant 0 : index
      %c0_25 = arith.constant 0 : index
      %28 = vector.load %arg7[%c0_23, %c0_24, %c0_25] : memref<1x32x1xf32, #tpu.memory_space<vmem>>, vector<1x32x1xf32>
      %29 = vector.shape_cast %28 : vector<1x32x1xf32> to vector<32x1xf32>
      %30 = vector.shape_cast %27 : vector<32x1xf32> to vector<1x32x1xf32>
      tpu.vector_store %arg7[%c0_23, %c0_24, %c0_25], %30 {strides = array<i32>} : memref<1x32x1xf32, #tpu.memory_space<vmem>>, vector<1x32x1xf32>,
      %cst_26 = arith.constant 0.000000e+00 : f32
      %31 = vector.broadcast %cst_26 : f32 to vector<32x1xf32>
      %c0_27 = arith.constant 0 : index
      %c0_28 = arith.constant 0 : index
      %c0_29 = arith.constant 0 : index
      %32 = vector.load %arg8[%c0_27, %c0_28, %c0_29] : memref<1x32x1xf32, #tpu.memory_space<vmem>>, vector<1x32x1xf32>
      %33 = vector.shape_cast %32 : vector<1x32x1xf32> to vector<32x1xf32>
      %34 = vector.shape_cast %31 : vector<32x1xf32> to vector<1x32x1xf32>
      tpu.vector_store %arg8[%c0_27, %c0_28, %c0_29], %34 {strides = array<i32>} : memref<1x32x1xf32, #tpu.memory_space<vmem>>, vector<1x32x1xf32>,
    } else {
    }
    %c0 = arith.constant 0 : index
    %c0_1 = arith.constant 0 : index
    %c0_2 = arith.constant 0 : index
    %3 = vector.load %arg2[%c0, %c0_1, %c0_2] : memref<1x32x256xf32, #tpu.memory_space<vmem>>, vector<1x32x256xf32>
    %4 = vector.shape_cast %3 : vector<1x32x256xf32> to vector<32x256xf32>
    %c0_3 = arith.constant 0 : index
    %c0_4 = arith.constant 0 : index
    %5 = vector.load %arg3[%c0_3, %c0_4] : memref<32x32xf32, #tpu.memory_space<vmem>>, vector<32x32xf32>
    %cst = arith.constant dense<0.000000e+00> : vector<32x256xf32>
    %6 = tpu.matmul %5, %4, %cst {dimension_numbers = #tpu.dot_dimension_numbers<[1], [0], [0], [1], [0, 0, 1, 1], [], []>} : vector<32x32xf32>, vector<32x256xf32>, vector<32x256xf32> -> vector<32x256xf32>
    %c0_5 = arith.constant 0 : index
    %c0_6 = arith.constant 0 : index
    %c0_7 = arith.constant 0 : index
    %7 = vector.load %arg6[%c0_5, %c0_6, %c0_7] : memref<1x32x256xf32, #tpu.memory_space<vmem>>, vector<1x32x256xf32>
    %8 = vector.shape_cast %7 : vector<1x32x256xf32> to vector<32x256xf32>
    %9 = vector.shape_cast %6 : vector<32x256xf32> to vector<1x32x256xf32>
    tpu.vector_store %arg6[%c0_5, %c0_6, %c0_7], %9 {strides = array<i32>} : memref<1x32x256xf32, #tpu.memory_space<vmem>>, vector<1x32x256xf32>,
    %c0_8 = arith.constant 0 : index
    %c0_9 = arith.constant 0 : index
    %c0_10 = arith.constant 0 : index
    %10 = vector.load %arg7[%c0_8, %c0_9, %c0_10] : memref<1x32x1xf32, #tpu.memory_space<vmem>>, vector<1x32x1xf32>
    %11 = vector.shape_cast %10 : vector<1x32x1xf32> to vector<32x1xf32>
    %cst_11 = arith.constant dense<0.000000e+00> : vector<32xf32>
    %12 = vector.multi_reduction <add>, %6, %cst_11 [1] : vector<32x256xf32> to vector<32xf32>
    %13 = vector.shape_cast %12 : vector<32xf32> to vector<32x1xf32>
    %14 = arith.addf %11, %13 : vector<32x1xf32>
    %c0_12 = arith.constant 0 : index
    %c0_13 = arith.constant 0 : index
    %c0_14 = arith.constant 0 : index
    %15 = vector.load %arg7[%c0_12, %c0_13, %c0_14] : memref<1x32x1xf32, #tpu.memory_space<vmem>>, vector<1x32x1xf32>
    %16 = vector.shape_cast %15 : vector<1x32x1xf32> to vector<32x1xf32>
    %17 = vector.shape_cast %14 : vector<32x1xf32> to vector<1x32x1xf32>
    tpu.vector_store %arg7[%c0_12, %c0_13, %c0_14], %17 {strides = array<i32>} : memref<1x32x1xf32, #tpu.memory_space<vmem>>, vector<1x32x1xf32>,
    %c0_15 = arith.constant 0 : index
    %c0_16 = arith.constant 0 : index
    %c0_17 = arith.constant 0 : index
    %18 = vector.load %arg8[%c0_15, %c0_16, %c0_17] : memref<1x32x1xf32, #tpu.memory_space<vmem>>, vector<1x32x1xf32>
    %19 = vector.shape_cast %18 : vector<1x32x1xf32> to vector<32x1xf32>
    %20 = arith.mulf %6, %6 : vector<32x256xf32>
    %cst_18 = arith.constant dense<0.000000e+00> : vector<32xf32>
    %21 = vector.multi_reduction <add>, %20, %cst_18 [1] : vector<32x256xf32> to vector<32xf32>
    %22 = vector.shape_cast %21 : vector<32xf32> to vector<32x1xf32>
    %23 = arith.addf %19, %22 : vector<32x1xf32>
    %c0_19 = arith.constant 0 : index
    %c0_20 = arith.constant 0 : index
    %c0_21 = arith.constant 0 : index
    %24 = vector.load %arg8[%c0_19, %c0_20, %c0_21] : memref<1x32x1xf32, #tpu.memory_space<vmem>>, vector<1x32x1xf32>
    %25 = vector.shape_cast %24 : vector<1x32x1xf32> to vector<32x1xf32>
    %26 = vector.shape_cast %23 : vector<32x1xf32> to vector<1x32x1xf32>
    tpu.vector_store %arg8[%c0_19, %c0_20, %c0_21], %26 {strides = array<i32>} : memref<1x32x1xf32, #tpu.memory_space<vmem>>, vector<1x32x1xf32>,
    return
  }
  func.func @transform_0(%arg0: i32, %arg1: i32) -> (i32, i32, i32) {
    %c0_i32 = arith.constant 0 : i32
    %c0_i32_0 = arith.constant 0 : i32
    return %arg0, %c0_i32, %arg1 : i32, i32, i32
  }
  func.func @transform_1(%arg0: i32, %arg1: i32) -> (i32, i32) {
    %c0_i32 = arith.constant 0 : i32
    %c0_i32_0 = arith.constant 0 : i32
    %c0_i32_1 = arith.constant 0 : i32
    return %c0_i32, %c0_i32_0 : i32, i32
  }
  func.func @transform_2(%arg0: i32, %arg1: i32) -> (i32, i32) {
    %c0_i32 = arith.constant 0 : i32
    %c0_i32_0 = arith.constant 0 : i32
    %c0_i32_1 = arith.constant 0 : i32
    return %c0_i32, %c0_i32_0 : i32, i32
  }
  func.func @transform_3(%arg0: i32, %arg1: i32) -> (i32, i32) {
    %c0_i32 = arith.constant 0 : i32
    %c0_i32_0 = arith.constant 0 : i32
    %c0_i32_1 = arith.constant 0 : i32
    return %c0_i32, %c0_i32_0 : i32, i32
  }
  func.func @transform_4(%arg0: i32, %arg1: i32) -> (i32, i32, i32) {
    %c0_i32 = arith.constant 0 : i32
    %c0_i32_0 = arith.constant 0 : i32
    return %arg0, %c0_i32, %arg1 : i32, i32, i32
  }
  func.func @transform_5(%arg0: i32, %arg1: i32) -> (i32, i32, i32) {
    %c0_i32 = arith.constant 0 : i32
    %c0_i32_0 = arith.constant 0 : i32
    %c0_i32_1 = arith.constant 0 : i32
    return %arg0, %c0_i32, %c0_i32_0 : i32, i32, i32
  }
  func.func @transform_6(%arg0: i32, %arg1: i32) -> (i32, i32, i32) {
    %c0_i32 = arith.constant 0 : i32
    %c0_i32_0 = arith.constant 0 : i32
    %c0_i32_1 = arith.constant 0 : i32
    return %arg0, %c0_i32, %c0_i32_0 : i32, i32, i32
  }
}

module attributes {stable_mosaic.version = 11 : i64} {
  func.func @_conv_stats_kernel(%arg0: i32, %arg1: i32, %arg2: memref<1x32x256xf32, #tpu.memory_space<vmem>>, %arg3: memref<32x32xf32, #tpu.memory_space<vmem>>, %arg4: memref<32x1xf32, #tpu.memory_space<vmem>>, %arg5: memref<32x1xf32, #tpu.memory_space<vmem>>, %arg6: memref<1x32x256xf32, #tpu.memory_space<vmem>>, %arg7: memref<1x32x1xf32, #tpu.memory_space<vmem>>, %arg8: memref<1x32x1xf32, #tpu.memory_space<vmem>>) attributes {dimension_semantics = [#tpu.dimension_semantics<parallel>, #tpu.dimension_semantics<arbitrary>], iteration_bounds = array<i64: 2, 1>, scalar_prefetch = 0 : i64, scratch_operands = 0 : i64, tpu.core_type = #tpu.core_type<tc>, window_params = [{transform_indices = @transform_0, window_bounds = array<i64: 1, 32, 256>}, {pipeline_mode = #tpu.pipeline_mode<synchronous>, transform_indices = @transform_1, window_bounds = array<i64: 32, 32>}, {pipeline_mode = #tpu.pipeline_mode<synchronous>, transform_indices = @transform_2, window_bounds = array<i64: 32, 1>}, {pipeline_mode = #tpu.pipeline_mode<synchronous>, transform_indices = @transform_3, window_bounds = array<i64: 32, 1>}, {transform_indices = @transform_4, window_bounds = array<i64: 1, 32, 256>}, {transform_indices = @transform_5, window_bounds = array<i64: 1, 32, 1>}, {transform_indices = @transform_6, window_bounds = array<i64: 1, 32, 1>}]} {
    %c0_i32 = arith.constant 0 : i32
    %0 = arith.cmpi eq, %arg1, %c0_i32 : i32
    %1 = arith.extui %0 : i1 to i32
    %c0_i32_0 = arith.constant 0 : i32
    %2 = arith.cmpi ne, %1, %c0_i32_0 : i32
    scf.if %2 {
      %cst_27 = arith.constant 0.000000e+00 : f32
      %35 = vector.broadcast %cst_27 : f32 to vector<32x1xf32>
      %c0_28 = arith.constant 0 : index
      %c0_29 = arith.constant 0 : index
      %c0_30 = arith.constant 0 : index
      %36 = vector.load %arg7[%c0_28, %c0_29, %c0_30] : memref<1x32x1xf32, #tpu.memory_space<vmem>>, vector<1x32x1xf32>
      %37 = vector.shape_cast %36 : vector<1x32x1xf32> to vector<32x1xf32>
      %38 = vector.shape_cast %35 : vector<32x1xf32> to vector<1x32x1xf32>
      tpu.vector_store %arg7[%c0_28, %c0_29, %c0_30], %38 {strides = array<i32>} : memref<1x32x1xf32, #tpu.memory_space<vmem>>, vector<1x32x1xf32>,
      %cst_31 = arith.constant 0.000000e+00 : f32
      %39 = vector.broadcast %cst_31 : f32 to vector<32x1xf32>
      %c0_32 = arith.constant 0 : index
      %c0_33 = arith.constant 0 : index
      %c0_34 = arith.constant 0 : index
      %40 = vector.load %arg8[%c0_32, %c0_33, %c0_34] : memref<1x32x1xf32, #tpu.memory_space<vmem>>, vector<1x32x1xf32>
      %41 = vector.shape_cast %40 : vector<1x32x1xf32> to vector<32x1xf32>
      %42 = vector.shape_cast %39 : vector<32x1xf32> to vector<1x32x1xf32>
      tpu.vector_store %arg8[%c0_32, %c0_33, %c0_34], %42 {strides = array<i32>} : memref<1x32x1xf32, #tpu.memory_space<vmem>>, vector<1x32x1xf32>,
    } else {
    }
    %c0 = arith.constant 0 : index
    %c0_1 = arith.constant 0 : index
    %c0_2 = arith.constant 0 : index
    %3 = vector.load %arg2[%c0, %c0_1, %c0_2] : memref<1x32x256xf32, #tpu.memory_space<vmem>>, vector<1x32x256xf32>
    %4 = vector.shape_cast %3 : vector<1x32x256xf32> to vector<32x256xf32>
    %c0_3 = arith.constant 0 : index
    %c0_4 = arith.constant 0 : index
    %5 = vector.load %arg4[%c0_3, %c0_4] : memref<32x1xf32, #tpu.memory_space<vmem>>, vector<32x1xf32>
    %6 = vector.broadcast %5 : vector<32x1xf32> to vector<32x256xf32>
    %7 = arith.mulf %4, %6 : vector<32x256xf32>
    %c0_5 = arith.constant 0 : index
    %c0_6 = arith.constant 0 : index
    %8 = vector.load %arg5[%c0_5, %c0_6] : memref<32x1xf32, #tpu.memory_space<vmem>>, vector<32x1xf32>
    %9 = vector.broadcast %8 : vector<32x1xf32> to vector<32x256xf32>
    %10 = arith.addf %7, %9 : vector<32x256xf32>
    %cst = arith.constant 0.000000e+00 : f32
    %11 = vector.broadcast %cst : f32 to vector<32x256xf32>
    %12 = arith.maximumf %10, %11 : vector<32x256xf32>
    %c0_7 = arith.constant 0 : index
    %c0_8 = arith.constant 0 : index
    %13 = vector.load %arg3[%c0_7, %c0_8] : memref<32x32xf32, #tpu.memory_space<vmem>>, vector<32x32xf32>
    %cst_9 = arith.constant dense<0.000000e+00> : vector<32x256xf32>
    %14 = tpu.matmul %13, %12, %cst_9 {dimension_numbers = #tpu.dot_dimension_numbers<[1], [0], [0], [1], [0, 0, 1, 1], [], []>} : vector<32x32xf32>, vector<32x256xf32>, vector<32x256xf32> -> vector<32x256xf32>
    %c0_10 = arith.constant 0 : index
    %c0_11 = arith.constant 0 : index
    %c0_12 = arith.constant 0 : index
    %15 = vector.load %arg6[%c0_10, %c0_11, %c0_12] : memref<1x32x256xf32, #tpu.memory_space<vmem>>, vector<1x32x256xf32>
    %16 = vector.shape_cast %15 : vector<1x32x256xf32> to vector<32x256xf32>
    %17 = vector.shape_cast %14 : vector<32x256xf32> to vector<1x32x256xf32>
    tpu.vector_store %arg6[%c0_10, %c0_11, %c0_12], %17 {strides = array<i32>} : memref<1x32x256xf32, #tpu.memory_space<vmem>>, vector<1x32x256xf32>,
    %c0_13 = arith.constant 0 : index
    %c0_14 = arith.constant 0 : index
    %c0_15 = arith.constant 0 : index
    %18 = vector.load %arg7[%c0_13, %c0_14, %c0_15] : memref<1x32x1xf32, #tpu.memory_space<vmem>>, vector<1x32x1xf32>
    %19 = vector.shape_cast %18 : vector<1x32x1xf32> to vector<32x1xf32>
    %cst_16 = arith.constant dense<0.000000e+00> : vector<32xf32>
    %20 = vector.multi_reduction <add>, %14, %cst_16 [1] : vector<32x256xf32> to vector<32xf32>
    %21 = vector.shape_cast %20 : vector<32xf32> to vector<32x1xf32>
    %22 = arith.addf %19, %21 : vector<32x1xf32>
    %c0_17 = arith.constant 0 : index
    %c0_18 = arith.constant 0 : index
    %c0_19 = arith.constant 0 : index
    %23 = vector.load %arg7[%c0_17, %c0_18, %c0_19] : memref<1x32x1xf32, #tpu.memory_space<vmem>>, vector<1x32x1xf32>
    %24 = vector.shape_cast %23 : vector<1x32x1xf32> to vector<32x1xf32>
    %25 = vector.shape_cast %22 : vector<32x1xf32> to vector<1x32x1xf32>
    tpu.vector_store %arg7[%c0_17, %c0_18, %c0_19], %25 {strides = array<i32>} : memref<1x32x1xf32, #tpu.memory_space<vmem>>, vector<1x32x1xf32>,
    %c0_20 = arith.constant 0 : index
    %c0_21 = arith.constant 0 : index
    %c0_22 = arith.constant 0 : index
    %26 = vector.load %arg8[%c0_20, %c0_21, %c0_22] : memref<1x32x1xf32, #tpu.memory_space<vmem>>, vector<1x32x1xf32>
    %27 = vector.shape_cast %26 : vector<1x32x1xf32> to vector<32x1xf32>
    %28 = arith.mulf %14, %14 : vector<32x256xf32>
    %cst_23 = arith.constant dense<0.000000e+00> : vector<32xf32>
    %29 = vector.multi_reduction <add>, %28, %cst_23 [1] : vector<32x256xf32> to vector<32xf32>
    %30 = vector.shape_cast %29 : vector<32xf32> to vector<32x1xf32>
    %31 = arith.addf %27, %30 : vector<32x1xf32>
    %c0_24 = arith.constant 0 : index
    %c0_25 = arith.constant 0 : index
    %c0_26 = arith.constant 0 : index
    %32 = vector.load %arg8[%c0_24, %c0_25, %c0_26] : memref<1x32x1xf32, #tpu.memory_space<vmem>>, vector<1x32x1xf32>
    %33 = vector.shape_cast %32 : vector<1x32x1xf32> to vector<32x1xf32>
    %34 = vector.shape_cast %31 : vector<32x1xf32> to vector<1x32x1xf32>
    tpu.vector_store %arg8[%c0_24, %c0_25, %c0_26], %34 {strides = array<i32>} : memref<1x32x1xf32, #tpu.memory_space<vmem>>, vector<1x32x1xf32>,
    return
  }
  func.func @transform_0(%arg0: i32, %arg1: i32) -> (i32, i32, i32) {
    %c0_i32 = arith.constant 0 : i32
    %c0_i32_0 = arith.constant 0 : i32
    return %arg0, %c0_i32, %arg1 : i32, i32, i32
  }
  func.func @transform_1(%arg0: i32, %arg1: i32) -> (i32, i32) {
    %c0_i32 = arith.constant 0 : i32
    %c0_i32_0 = arith.constant 0 : i32
    %c0_i32_1 = arith.constant 0 : i32
    return %c0_i32, %c0_i32_0 : i32, i32
  }
  func.func @transform_2(%arg0: i32, %arg1: i32) -> (i32, i32) {
    %c0_i32 = arith.constant 0 : i32
    %c0_i32_0 = arith.constant 0 : i32
    %c0_i32_1 = arith.constant 0 : i32
    return %c0_i32, %c0_i32_0 : i32, i32
  }
  func.func @transform_3(%arg0: i32, %arg1: i32) -> (i32, i32) {
    %c0_i32 = arith.constant 0 : i32
    %c0_i32_0 = arith.constant 0 : i32
    %c0_i32_1 = arith.constant 0 : i32
    return %c0_i32, %c0_i32_0 : i32, i32
  }
  func.func @transform_4(%arg0: i32, %arg1: i32) -> (i32, i32, i32) {
    %c0_i32 = arith.constant 0 : i32
    %c0_i32_0 = arith.constant 0 : i32
    return %arg0, %c0_i32, %arg1 : i32, i32, i32
  }
  func.func @transform_5(%arg0: i32, %arg1: i32) -> (i32, i32, i32) {
    %c0_i32 = arith.constant 0 : i32
    %c0_i32_0 = arith.constant 0 : i32
    %c0_i32_1 = arith.constant 0 : i32
    return %arg0, %c0_i32, %c0_i32_0 : i32, i32, i32
  }
  func.func @transform_6(%arg0: i32, %arg1: i32) -> (i32, i32, i32) {
    %c0_i32 = arith.constant 0 : i32
    %c0_i32_0 = arith.constant 0 : i32
    %c0_i32_1 = arith.constant 0 : i32
    return %arg0, %c0_i32, %c0_i32_0 : i32, i32, i32
  }
}

module attributes {stable_mosaic.version = 11 : i64} {
  func.func @_conv_stats_kernel(%arg0: i32, %arg1: i32, %arg2: memref<1x32x256xf32, #tpu.memory_space<vmem>>, %arg3: memref<32x32xf32, #tpu.memory_space<vmem>>, %arg4: memref<32x1xf32, #tpu.memory_space<vmem>>, %arg5: memref<32x1xf32, #tpu.memory_space<vmem>>, %arg6: memref<1x32x1xf32, #tpu.memory_space<vmem>>, %arg7: memref<1x32x1xf32, #tpu.memory_space<vmem>>) attributes {dimension_semantics = [#tpu.dimension_semantics<parallel>, #tpu.dimension_semantics<arbitrary>], iteration_bounds = array<i64: 2, 1>, scalar_prefetch = 0 : i64, scratch_operands = 0 : i64, tpu.core_type = #tpu.core_type<tc>, window_params = [{transform_indices = @transform_0, window_bounds = array<i64: 1, 32, 256>}, {pipeline_mode = #tpu.pipeline_mode<synchronous>, transform_indices = @transform_1, window_bounds = array<i64: 32, 32>}, {pipeline_mode = #tpu.pipeline_mode<synchronous>, transform_indices = @transform_2, window_bounds = array<i64: 32, 1>}, {pipeline_mode = #tpu.pipeline_mode<synchronous>, transform_indices = @transform_3, window_bounds = array<i64: 32, 1>}, {transform_indices = @transform_4, window_bounds = array<i64: 1, 32, 1>}, {transform_indices = @transform_5, window_bounds = array<i64: 1, 32, 1>}]} {
    %c0_i32 = arith.constant 0 : i32
    %0 = arith.cmpi eq, %arg1, %c0_i32 : i32
    %1 = arith.extui %0 : i1 to i32
    %c0_i32_0 = arith.constant 0 : i32
    %2 = arith.cmpi ne, %1, %c0_i32_0 : i32
    scf.if %2 {
      %cst_24 = arith.constant 0.000000e+00 : f32
      %32 = vector.broadcast %cst_24 : f32 to vector<32x1xf32>
      %c0_25 = arith.constant 0 : index
      %c0_26 = arith.constant 0 : index
      %c0_27 = arith.constant 0 : index
      %33 = vector.load %arg6[%c0_25, %c0_26, %c0_27] : memref<1x32x1xf32, #tpu.memory_space<vmem>>, vector<1x32x1xf32>
      %34 = vector.shape_cast %33 : vector<1x32x1xf32> to vector<32x1xf32>
      %35 = vector.shape_cast %32 : vector<32x1xf32> to vector<1x32x1xf32>
      tpu.vector_store %arg6[%c0_25, %c0_26, %c0_27], %35 {strides = array<i32>} : memref<1x32x1xf32, #tpu.memory_space<vmem>>, vector<1x32x1xf32>,
      %cst_28 = arith.constant 0.000000e+00 : f32
      %36 = vector.broadcast %cst_28 : f32 to vector<32x1xf32>
      %c0_29 = arith.constant 0 : index
      %c0_30 = arith.constant 0 : index
      %c0_31 = arith.constant 0 : index
      %37 = vector.load %arg7[%c0_29, %c0_30, %c0_31] : memref<1x32x1xf32, #tpu.memory_space<vmem>>, vector<1x32x1xf32>
      %38 = vector.shape_cast %37 : vector<1x32x1xf32> to vector<32x1xf32>
      %39 = vector.shape_cast %36 : vector<32x1xf32> to vector<1x32x1xf32>
      tpu.vector_store %arg7[%c0_29, %c0_30, %c0_31], %39 {strides = array<i32>} : memref<1x32x1xf32, #tpu.memory_space<vmem>>, vector<1x32x1xf32>,
    } else {
    }
    %c0 = arith.constant 0 : index
    %c0_1 = arith.constant 0 : index
    %c0_2 = arith.constant 0 : index
    %3 = vector.load %arg2[%c0, %c0_1, %c0_2] : memref<1x32x256xf32, #tpu.memory_space<vmem>>, vector<1x32x256xf32>
    %4 = vector.shape_cast %3 : vector<1x32x256xf32> to vector<32x256xf32>
    %c0_3 = arith.constant 0 : index
    %c0_4 = arith.constant 0 : index
    %5 = vector.load %arg4[%c0_3, %c0_4] : memref<32x1xf32, #tpu.memory_space<vmem>>, vector<32x1xf32>
    %6 = vector.broadcast %5 : vector<32x1xf32> to vector<32x256xf32>
    %7 = arith.mulf %4, %6 : vector<32x256xf32>
    %c0_5 = arith.constant 0 : index
    %c0_6 = arith.constant 0 : index
    %8 = vector.load %arg5[%c0_5, %c0_6] : memref<32x1xf32, #tpu.memory_space<vmem>>, vector<32x1xf32>
    %9 = vector.broadcast %8 : vector<32x1xf32> to vector<32x256xf32>
    %10 = arith.addf %7, %9 : vector<32x256xf32>
    %cst = arith.constant 0.000000e+00 : f32
    %11 = vector.broadcast %cst : f32 to vector<32x256xf32>
    %12 = arith.maximumf %10, %11 : vector<32x256xf32>
    %c0_7 = arith.constant 0 : index
    %c0_8 = arith.constant 0 : index
    %13 = vector.load %arg3[%c0_7, %c0_8] : memref<32x32xf32, #tpu.memory_space<vmem>>, vector<32x32xf32>
    %cst_9 = arith.constant dense<0.000000e+00> : vector<32x256xf32>
    %14 = tpu.matmul %13, %12, %cst_9 {dimension_numbers = #tpu.dot_dimension_numbers<[1], [0], [0], [1], [0, 0, 1, 1], [], []>} : vector<32x32xf32>, vector<32x256xf32>, vector<32x256xf32> -> vector<32x256xf32>
    %c0_10 = arith.constant 0 : index
    %c0_11 = arith.constant 0 : index
    %c0_12 = arith.constant 0 : index
    %15 = vector.load %arg6[%c0_10, %c0_11, %c0_12] : memref<1x32x1xf32, #tpu.memory_space<vmem>>, vector<1x32x1xf32>
    %16 = vector.shape_cast %15 : vector<1x32x1xf32> to vector<32x1xf32>
    %cst_13 = arith.constant dense<0.000000e+00> : vector<32xf32>
    %17 = vector.multi_reduction <add>, %14, %cst_13 [1] : vector<32x256xf32> to vector<32xf32>
    %18 = vector.shape_cast %17 : vector<32xf32> to vector<32x1xf32>
    %19 = arith.addf %16, %18 : vector<32x1xf32>
    %c0_14 = arith.constant 0 : index
    %c0_15 = arith.constant 0 : index
    %c0_16 = arith.constant 0 : index
    %20 = vector.load %arg6[%c0_14, %c0_15, %c0_16] : memref<1x32x1xf32, #tpu.memory_space<vmem>>, vector<1x32x1xf32>
    %21 = vector.shape_cast %20 : vector<1x32x1xf32> to vector<32x1xf32>
    %22 = vector.shape_cast %19 : vector<32x1xf32> to vector<1x32x1xf32>
    tpu.vector_store %arg6[%c0_14, %c0_15, %c0_16], %22 {strides = array<i32>} : memref<1x32x1xf32, #tpu.memory_space<vmem>>, vector<1x32x1xf32>,
    %c0_17 = arith.constant 0 : index
    %c0_18 = arith.constant 0 : index
    %c0_19 = arith.constant 0 : index
    %23 = vector.load %arg7[%c0_17, %c0_18, %c0_19] : memref<1x32x1xf32, #tpu.memory_space<vmem>>, vector<1x32x1xf32>
    %24 = vector.shape_cast %23 : vector<1x32x1xf32> to vector<32x1xf32>
    %25 = arith.mulf %14, %14 : vector<32x256xf32>
    %cst_20 = arith.constant dense<0.000000e+00> : vector<32xf32>
    %26 = vector.multi_reduction <add>, %25, %cst_20 [1] : vector<32x256xf32> to vector<32xf32>
    %27 = vector.shape_cast %26 : vector<32xf32> to vector<32x1xf32>
    %28 = arith.addf %24, %27 : vector<32x1xf32>
    %c0_21 = arith.constant 0 : index
    %c0_22 = arith.constant 0 : index
    %c0_23 = arith.constant 0 : index
    %29 = vector.load %arg7[%c0_21, %c0_22, %c0_23] : memref<1x32x1xf32, #tpu.memory_space<vmem>>, vector<1x32x1xf32>
    %30 = vector.shape_cast %29 : vector<1x32x1xf32> to vector<32x1xf32>
    %31 = vector.shape_cast %28 : vector<32x1xf32> to vector<1x32x1xf32>
    tpu.vector_store %arg7[%c0_21, %c0_22, %c0_23], %31 {strides = array<i32>} : memref<1x32x1xf32, #tpu.memory_space<vmem>>, vector<1x32x1xf32>,
    return
  }
  func.func @transform_0(%arg0: i32, %arg1: i32) -> (i32, i32, i32) {
    %c0_i32 = arith.constant 0 : i32
    %c0_i32_0 = arith.constant 0 : i32
    return %arg0, %c0_i32, %arg1 : i32, i32, i32
  }
  func.func @transform_1(%arg0: i32, %arg1: i32) -> (i32, i32) {
    %c0_i32 = arith.constant 0 : i32
    %c0_i32_0 = arith.constant 0 : i32
    %c0_i32_1 = arith.constant 0 : i32
    return %c0_i32, %c0_i32_0 : i32, i32
  }
  func.func @transform_2(%arg0: i32, %arg1: i32) -> (i32, i32) {
    %c0_i32 = arith.constant 0 : i32
    %c0_i32_0 = arith.constant 0 : i32
    %c0_i32_1 = arith.constant 0 : i32
    return %c0_i32, %c0_i32_0 : i32, i32
  }
  func.func @transform_3(%arg0: i32, %arg1: i32) -> (i32, i32) {
    %c0_i32 = arith.constant 0 : i32
    %c0_i32_0 = arith.constant 0 : i32
    %c0_i32_1 = arith.constant 0 : i32
    return %c0_i32, %c0_i32_0 : i32, i32
  }
  func.func @transform_4(%arg0: i32, %arg1: i32) -> (i32, i32, i32) {
    %c0_i32 = arith.constant 0 : i32
    %c0_i32_0 = arith.constant 0 : i32
    %c0_i32_1 = arith.constant 0 : i32
    return %arg0, %c0_i32, %c0_i32_0 : i32, i32, i32
  }
  func.func @transform_5(%arg0: i32, %arg1: i32) -> (i32, i32, i32) {
    %c0_i32 = arith.constant 0 : i32
    %c0_i32_0 = arith.constant 0 : i32
    %c0_i32_1 = arith.constant 0 : i32
    return %arg0, %c0_i32, %c0_i32_0 : i32, i32, i32
  }
}

module attributes {stable_mosaic.version = 11 : i64} {
  func.func @_final_kernel(%arg0: i32, %arg1: i32, %arg2: memref<1x32x256xf32, #tpu.memory_space<vmem>>, %arg3: memref<32x32xf32, #tpu.memory_space<vmem>>, %arg4: memref<32x1xf32, #tpu.memory_space<vmem>>, %arg5: memref<32x1xf32, #tpu.memory_space<vmem>>, %arg6: memref<32x1xf32, #tpu.memory_space<vmem>>, %arg7: memref<32x1xf32, #tpu.memory_space<vmem>>, %arg8: memref<1x32x256xf32, #tpu.memory_space<vmem>>) attributes {dimension_semantics = [#tpu.dimension_semantics<parallel>, #tpu.dimension_semantics<parallel>], iteration_bounds = array<i64: 2, 1>, scalar_prefetch = 0 : i64, scratch_operands = 0 : i64, tpu.core_type = #tpu.core_type<tc>, window_params = [{transform_indices = @transform_0, window_bounds = array<i64: 1, 32, 256>}, {pipeline_mode = #tpu.pipeline_mode<synchronous>, transform_indices = @transform_1, window_bounds = array<i64: 32, 32>}, {pipeline_mode = #tpu.pipeline_mode<synchronous>, transform_indices = @transform_2, window_bounds = array<i64: 32, 1>}, {pipeline_mode = #tpu.pipeline_mode<synchronous>, transform_indices = @transform_3, window_bounds = array<i64: 32, 1>}, {pipeline_mode = #tpu.pipeline_mode<synchronous>, transform_indices = @transform_4, window_bounds = array<i64: 32, 1>}, {pipeline_mode = #tpu.pipeline_mode<synchronous>, transform_indices = @transform_5, window_bounds = array<i64: 32, 1>}, {transform_indices = @transform_6, window_bounds = array<i64: 1, 32, 256>}]} {
    %c0 = arith.constant 0 : index
    %c0_0 = arith.constant 0 : index
    %c0_1 = arith.constant 0 : index
    %0 = vector.load %arg2[%c0, %c0_0, %c0_1] : memref<1x32x256xf32, #tpu.memory_space<vmem>>, vector<1x32x256xf32>
    %1 = vector.shape_cast %0 : vector<1x32x256xf32> to vector<32x256xf32>
    %c0_2 = arith.constant 0 : index
    %c0_3 = arith.constant 0 : index
    %2 = vector.load %arg4[%c0_2, %c0_3] : memref<32x1xf32, #tpu.memory_space<vmem>>, vector<32x1xf32>
    %3 = vector.broadcast %2 : vector<32x1xf32> to vector<32x256xf32>
    %4 = arith.mulf %1, %3 : vector<32x256xf32>
    %c0_4 = arith.constant 0 : index
    %c0_5 = arith.constant 0 : index
    %5 = vector.load %arg5[%c0_4, %c0_5] : memref<32x1xf32, #tpu.memory_space<vmem>>, vector<32x1xf32>
    %6 = vector.broadcast %5 : vector<32x1xf32> to vector<32x256xf32>
    %7 = arith.addf %4, %6 : vector<32x256xf32>
    %cst = arith.constant 0.000000e+00 : f32
    %8 = vector.broadcast %cst : f32 to vector<32x256xf32>
    %9 = arith.maximumf %7, %8 : vector<32x256xf32>
    %c0_6 = arith.constant 0 : index
    %c0_7 = arith.constant 0 : index
    %10 = vector.load %arg3[%c0_6, %c0_7] : memref<32x32xf32, #tpu.memory_space<vmem>>, vector<32x32xf32>
    %cst_8 = arith.constant dense<0.000000e+00> : vector<32x256xf32>
    %11 = tpu.matmul %10, %9, %cst_8 {dimension_numbers = #tpu.dot_dimension_numbers<[1], [0], [0], [1], [0, 0, 1, 1], [], []>} : vector<32x32xf32>, vector<32x256xf32>, vector<32x256xf32> -> vector<32x256xf32>
    %c0_9 = arith.constant 0 : index
    %c0_10 = arith.constant 0 : index
    %12 = vector.load %arg6[%c0_9, %c0_10] : memref<32x1xf32, #tpu.memory_space<vmem>>, vector<32x1xf32>
    %13 = vector.broadcast %12 : vector<32x1xf32> to vector<32x256xf32>
    %14 = arith.mulf %11, %13 : vector<32x256xf32>
    %c0_11 = arith.constant 0 : index
    %c0_12 = arith.constant 0 : index
    %15 = vector.load %arg7[%c0_11, %c0_12] : memref<32x1xf32, #tpu.memory_space<vmem>>, vector<32x1xf32>
    %16 = vector.broadcast %15 : vector<32x1xf32> to vector<32x256xf32>
    %17 = arith.addf %14, %16 : vector<32x256xf32>
    %c0_13 = arith.constant 0 : index
    %c0_14 = arith.constant 0 : index
    %c0_15 = arith.constant 0 : index
    %18 = vector.load %arg8[%c0_13, %c0_14, %c0_15] : memref<1x32x256xf32, #tpu.memory_space<vmem>>, vector<1x32x256xf32>
    %19 = vector.shape_cast %18 : vector<1x32x256xf32> to vector<32x256xf32>
    %20 = vector.shape_cast %17 : vector<32x256xf32> to vector<1x32x256xf32>
    tpu.vector_store %arg8[%c0_13, %c0_14, %c0_15], %20 {strides = array<i32>} : memref<1x32x256xf32, #tpu.memory_space<vmem>>, vector<1x32x256xf32>,
    return
  }
  func.func @transform_0(%arg0: i32, %arg1: i32) -> (i32, i32, i32) {
    %c0_i32 = arith.constant 0 : i32
    %c0_i32_0 = arith.constant 0 : i32
    return %arg0, %c0_i32, %arg1 : i32, i32, i32
  }
  func.func @transform_1(%arg0: i32, %arg1: i32) -> (i32, i32) {
    %c0_i32 = arith.constant 0 : i32
    %c0_i32_0 = arith.constant 0 : i32
    %c0_i32_1 = arith.constant 0 : i32
    return %c0_i32, %c0_i32_0 : i32, i32
  }
  func.func @transform_2(%arg0: i32, %arg1: i32) -> (i32, i32) {
    %c0_i32 = arith.constant 0 : i32
    %c0_i32_0 = arith.constant 0 : i32
    %c0_i32_1 = arith.constant 0 : i32
    return %c0_i32, %c0_i32_0 : i32, i32
  }
  func.func @transform_3(%arg0: i32, %arg1: i32) -> (i32, i32) {
    %c0_i32 = arith.constant 0 : i32
    %c0_i32_0 = arith.constant 0 : i32
    %c0_i32_1 = arith.constant 0 : i32
    return %c0_i32, %c0_i32_0 : i32, i32
  }
  func.func @transform_4(%arg0: i32, %arg1: i32) -> (i32, i32) {
    %c0_i32 = arith.constant 0 : i32
    %c0_i32_0 = arith.constant 0 : i32
    %c0_i32_1 = arith.constant 0 : i32
    return %c0_i32, %c0_i32_0 : i32, i32
  }
  func.func @transform_5(%arg0: i32, %arg1: i32) -> (i32, i32) {
    %c0_i32 = arith.constant 0 : i32
    %c0_i32_0 = arith.constant 0 : i32
    %c0_i32_1 = arith.constant 0 : i32
    return %c0_i32, %c0_i32_0 : i32, i32
  }
  func.func @transform_6(%arg0: i32, %arg1: i32) -> (i32, i32, i32) {
    %c0_i32 = arith.constant 0 : i32
    %c0_i32_0 = arith.constant 0 : i32
    return %arg0, %c0_i32, %arg1 : i32, i32, i32
  }
}

</mosaic_0001>

<bundles_post_ra>
// kernel: projector_c_forward.4
= control target key start
LH: loop header
LB: loop body
LE: loop exit
PB: predicated region body
PF: predicated region fallthrough
CT: control target
= control target key end

     0   :  { %s781_s21 = smov 0   ;;  %s783_s22 = smov 0   ;;  %s884_s0 = inlined_call_operand.vmem [shape: f32[2,32,256], index: 0, kind: input, shape index: {}]   ;;  %s885_s1 = inlined_call_operand.vmem [shape: f32[32,32], index: 1, kind: input, shape index: {}]   ;;  %s886_s2 = inlined_call_operand.vmem [shape: f32[32,1], index: 2, kind: input, shape index: {}]   ;;  %s887_s3 = inlined_call_operand.vmem [shape: f32[32,1], index: 3, kind: input, shape index: {}]   ;;  %s888_s4 = inlined_call_operand.vmem [shape: f32[2,32,256], index: 4, kind: output, shape index: {0}]   ;;  %s889_s5 = inlined_call_operand.vmem [shape: f32[2,32,1], index: 5, kind: output, shape index: {1}]   ;;  %s890_s6 = inlined_call_operand.vmem [shape: f32[2,32,1], index: 6, kind: output, shape index: {2}]  }
   0x1   :  { %s785_s23 = smov 0  }
   0x2 LB: > { %s29_s2 = sadd.s32 1, %s739_s22  ;;  %p665_p0 = scmp.ge.s32.totalorder %s743_s23, 1  ;;  %s743_s23 = sphi %s785_s23, %s17_s23   ;;  %s739_s22 = sphi %s783_s22, %s892_s22   ;;  %s735_s21 = sphi %s781_s21, %s891_s21  }
   0x3   : > { %p31_p1 = scmp.ge.s32.totalorder %s29_s2, 2  ;;  %p238_p2 = scmp.lt.s32.totalorder %s743_s23, 3 }
   0x5   : > { %s894_s2 = smov (%p31_p1, %s29_s2), 0  ;;  %p239_p3 = pnand %p665_p0, %p238_p2 }
   0x6   : > { %p287_p4 = scmp.lt.s32.totalorder (!%p239_p3), %s735_s21, 1  ;;  %v745_v0 = vmov (!%p239_p3), 0.0   ;;  %v337_v13 = vld [vmem:[%s885_s1] sm:$0xff] (!%p239_p3)  ;;  %vm341_vm0 = vcmask (!%p239_p3), 261120   ;;  %v339_v14 = vld [vmem:[%s885_s1 + $0x10] sm:$0xff] (!%p239_p3)  ;;  %v340_v15 = vld [vmem:[%s885_s1 + $0x18] sm:$0xff] (!%p239_p3) }
   0x7   : > { %242 = sbr.rel (%p239_p3) target bundleno = 400 (0x190), region = 36  ;;  %418 = vmatprep.mubr.f32.mxu0 (!%p239_p3), %v745_v0  ;;  %430 = vmatprep.mubr.f32.mxu1 (!%p239_p3), %v745_v0  ;;  %v338_v16 = vld [vmem:[%s885_s1 + $0x8] sm:$0xff] (!%p239_p3)  ;;  %vm320_vm1 = vcmask (!%p239_p3), 7168  }
   0xe   : > { %s896_s21 = smov (!%p287_p4, %s735_s21), 1 }
   0xf   : > { %s680_s3 = sshll.u32 %s896_s21, 6  ;;  %s682_s11 = sshll.u32 %s896_s21, 5 }
  0x10   : > { %s294_s26 = scalar_lea.vmem %s884_s0, %s680_s3  ;;  %s823_s14 = scalar_lea.vmem %s889_s5, %s682_s11 }
  0x11   : > { %v330_v1 = vld [vmem:[%s294_s26 + $0x8] sm:$0xff]  ;;  %v332_v2 = vld [vmem:[%s294_s26 + $0x18] sm:$0xff]  ;;  %v329_v3 = vld [vmem:[%s294_s26] sm:$0xff]  ;;  %s828_s17 = scalar_lea.vmem %s890_s6, %s682_s11  ;;  %323 = vst.msk [vmem:[%s823_s14 + $0x10] sm:$0xff] %vm320_vm1, %v745_v0  ;;  %s304_s20 = scalar_lea.vmem %s888_s4, %s680_s3 }
  0x12   : > { %v684_v4 = vpack.c.bf16 %v332_v2, %v330_v1  ;;  %v331_v5 = vld [vmem:[%s294_s26 + $0x10] sm:$0xff]  ;;  %v334_v6 = vld [vmem:[%s294_s26 + $0x28] sm:$0xff]  ;;  %v336_v7 = vld [vmem:[%s294_s26 + $0x38] sm:$0xff]  ;;  %321 = vst.msk [vmem:[%s823_s14] sm:$0xff] %vm320_vm1, %v745_v0 }
  0x13   : > { %v686_v8 = vpack.c.bf16 %v331_v5, %v329_v3  ;;  %v688_v9 = vpack.c.bf16 %v336_v7, %v334_v6  ;;  %v333_v10 = vld [vmem:[%s294_s26 + $0x20] sm:$0xff]  ;;  %v335_v11 = vld [vmem:[%s294_s26 + $0x30] sm:$0xff]  ;;  %322 = vst.msk [vmem:[%s823_s14 + $0x8] sm:$0xff] %vm320_vm1, %v745_v0  ;;  %324 = vst.msk [vmem:[%s823_s14 + $0x18] sm:$0xff] %vm320_vm1, %v745_v0 }
  0x14   : > { %685 = vmatprep.subr.bf16.mxu0 %v684_v4  ;;  %692 = vmatprep.subr.bf16.mxu1 %v684_v4  ;;  %v690_v12 = vpack.c.bf16 %v335_v11, %v333_v10  ;;  %325 = vst.msk [vmem:[%s828_s17] sm:$0xff] %vm320_vm1, %v745_v0  ;;  %326 = vst.msk [vmem:[%s828_s17 + $0x8] sm:$0xff] %vm320_vm1, %v745_v0 }
  0x15   : > { %687 = vmatpush1.bf16.msra.mxu0 %v686_v8  ;;  %694 = vmatpush1.bf16.msra.mxu1 %v686_v8  ;;  %327 = vst.msk [vmem:[%s828_s17 + $0x10] sm:$0xff] %vm320_vm1, %v745_v0  ;;  %328 = vst.msk [vmem:[%s828_s17 + $0x18] sm:$0xff] %vm320_vm1, %v745_v0 }
  0x16   : > { %689 = vmatprep.subr.bf16.mxu0 %v688_v9  ;;  %693 = vmatprep.subr.bf16.mxu1 %v688_v9 }
  0x18   : > { %v453_v41 = vld [vmem:[%s823_s14 + $0x10] sm:$0xff] }
  0x19   : > { %691 = vmatpush1.bf16.msra.mxu0 %v690_v12  ;;  %695 = vmatpush1.bf16.msra.mxu1 %v690_v12  ;;  %v451_v42 = vld [vmem:[%s823_s14] sm:$0xff] }
  0x1a   : > { %v454_v47 = vld [vmem:[%s823_s14 + $0x18] sm:$0xff]  ;;  %v452_v54 = vld [vmem:[%s823_s14 + $0x8] sm:$0xff] }
  0x1b   : > { %v476_v48 = vld [vmem:[%s828_s17] sm:$0xff]  ;;  %v477_v53 = vld [vmem:[%s828_s17 + $0x8] sm:$0xff] }
  0x1c   : > { %674 = vmatmul.mubr.msk.f32.vlgmr.msra.gmra.mrb[0].mxu0 %vm341_vm0, %v337_v13  ;;  %676 = vmatmul.mubr.msk.f32.vlgmr.msra.gmra.mrb[0].mxu1 %vm341_vm0, %v339_v14  ;;  %v479_v59 = vld [vmem:[%s828_s17 + $0x18] sm:$0xff]  ;;  %v478_v60 = vld [vmem:[%s828_s17 + $0x10] sm:$0xff] }
  0x1d   : > { %436 = vmatprep.mubr.f32.mxu1 %v745_v0  ;;  %424 = vmatprep.mubr.f32.mxu0 %v745_v0 }
  0x20   : > { %677 = vmatmul.mubr.msk.f32.gmra.mrb[2].mxu1 %vm341_vm0, %v340_v15  ;;  %675 = vmatmul.mubr.msk.f32.gmra.mrb[2].mxu0 %vm341_vm0, %v338_v16 }
  0xef   : > { %v420_v17 = vpop.f32.mrb[0].mxu0  ;;  %v432_v18 = vpop.f32.mrb[0].mxu1 }
  0xf0   : > { %443 = vst [vmem:[%s304_s20] sm:$0xff] %v420_v17  ;;  %447 = vst [vmem:[%s304_s20 + $0x20] sm:$0xff] %v432_v18  ;;  %v422_v19 = vpop.f32.mrb[1].mxu0  ;;  %v434_v20 = vpop.f32.mrb[1].mxu1  ;;  %v480_v21 = vmul.f32 %v420_v17, %v420_v17  ;;  %v484_v22 = vmul.f32 %v432_v18, %v432_v18 }
  0xf1   : > { %444 = vst [vmem:[%s304_s20 + $0x8] sm:$0xff] %v422_v19  ;;  %448 = vst [vmem:[%s304_s20 + $0x28] sm:$0xff] %v434_v20  ;;  %v461_v23 = vadd.f32 %v434_v20, %v432_v18  ;;  %v455_v24 = vadd.f32 %v422_v19, %v420_v17  ;;  %v481_v25 = vmul.f32 %v422_v19, %v422_v19 }
  0xf2   : > { %v485_v26 = vmul.f32 %v434_v20, %v434_v20 }
  0xf3   : > { %462 = vadd.xlane.f32.xlu1 %v461_v23  ;;  %v438_v27 = vpop.f32.mrb[2].mxu1  ;;  %456 = vadd.xlane.f32.xlu0 %v455_v24  ;;  %v426_v28 = vpop.f32.mrb[2].mxu0  ;;  %v488_v29 = vadd.f32 %v481_v25, %v480_v21 }
  0xf4   : > { %v494_v30 = vadd.f32 %v485_v26, %v484_v22  ;;  %449 = vst [vmem:[%s304_s20 + $0x30] sm:$0xff] %v438_v27  ;;  %445 = vst [vmem:[%s304_s20 + $0x10] sm:$0xff] %v426_v28  ;;  %v440_v31 = vpop.f32.mrb[3].mxu1  ;;  %v428_v32 = vpop.f32.mrb[3].mxu0  ;;  %v482_v33 = vmul.f32 %v426_v28, %v426_v28  ;;  %v486_v34 = vmul.f32 %v438_v27, %v438_v27 }
  0xf5   : > { %450 = vst [vmem:[%s304_s20 + $0x38] sm:$0xff] %v440_v31  ;;  %v487_v35 = vmul.f32 %v440_v31, %v440_v31  ;;  %446 = vst [vmem:[%s304_s20 + $0x18] sm:$0xff] %v428_v32  ;;  %v483_v36 = vmul.f32 %v428_v32, %v428_v32  ;;  %v464_v37 = vadd.f32 %v440_v31, %v438_v27 }
  0xf6   : > { %v458_v38 = vadd.f32 %v428_v32, %v426_v28 }
  0xf7   : > { %465 = vadd.xlane.f32.xlu1 %v464_v37  ;;  %489 = vadd.xlane.f32.xlu0 %v488_v29  ;;  %v491_v39 = vadd.f32 %v483_v36, %v482_v33  ;;  %v497_v40 = vadd.f32 %v487_v35, %v486_v34 }
  0xfb   : > { %492 = vadd.xlane.f32.xlu1 %v491_v39  ;;  %459 = vadd.xlane.f32.xlu0 %v458_v38 }
  0xff   : > { %498 = vadd.xlane.f32.xlu1 %v497_v40  ;;  %495 = vadd.xlane.f32.xlu0 %v494_v30 }
 0x180   : > { %v463_v43 = vpop.xlane.xlu1 %462  ;;  %v457_v44 = vpop.xlane.xlu0 %456 }
 0x181   : > { %v469_v45 = vadd.f32 %v463_v43, %v453_v41  ;;  %v467_v46 = vadd.f32 %v457_v44, %v451_v42 }
 0x183   : > { %474 = vst.msk [vmem:[%s823_s14 + $0x10] sm:$0xff] %vm320_vm1, %v469_v45  ;;  %472 = vst.msk [vmem:[%s823_s14] sm:$0xff] %vm320_vm1, %v467_v46 }
 0x184   : > { %v466_v49 = vpop.xlane.xlu1 %465  ;;  %v490_v50 = vpop.xlane.xlu0 %489 }
 0x185   : > { %v470_v51 = vadd.f32 %v466_v49, %v454_v47  ;;  %v500_v52 = vadd.f32 %v490_v50, %v476_v48 }
 0x187   : > { %475 = vst.msk [vmem:[%s823_s14 + $0x18] sm:$0xff] %vm320_vm1, %v470_v51  ;;  %504 = vst.msk [vmem:[%s828_s17] sm:$0xff] %vm320_vm1, %v500_v52 }
 0x188   : > { %v493_v55 = vpop.xlane.xlu1 %492  ;;  %v460_v56 = vpop.xlane.xlu0 %459 }
 0x189   : > { %v501_v57 = vadd.f32 %v493_v55, %v477_v53  ;;  %v468_v58 = vadd.f32 %v460_v56, %v452_v54 }
 0x18b   : > { %505 = vst.msk [vmem:[%s828_s17 + $0x8] sm:$0xff] %vm320_vm1, %v501_v57  ;;  %473 = vst.msk [vmem:[%s823_s14 + $0x8] sm:$0xff] %vm320_vm1, %v468_v58 }
 0x18c   : > { %v499_v61 = vpop.xlane.xlu1 %498  ;;  %v496_v62 = vpop.xlane.xlu0 %495 }
 0x18d   : > { %v503_v63 = vadd.f32 %v499_v61, %v479_v59  ;;  %v502_v0 = vadd.f32 %v496_v62, %v478_v60 }
 0x18f   : > { %507 = vst.msk [vmem:[%s828_s17 + $0x18] sm:$0xff] %vm320_vm1, %v503_v63  ;;  %506 = vst.msk [vmem:[%s828_s17 + $0x10] sm:$0xff] %vm320_vm1, %v502_v0 }
 0x190 PF: > { %s17_s23 = sadd.s32 1, %s743_s23   ;;  %s891_s21 = smov %s739_s22 }
 0x191   : > { %p14_p5 = scmp.ge.s32.totalorder %s17_s23, 4   ;;  %s892_s22 = smov %s894_s2 }
 0x193   :  { %16 = sbr.rel (!%p14_p5) target bundleno = 2 (0x2), region = 94 }

// kernel: projector_c_forward.6
= control target key start
LH: loop header
LB: loop body
LE: loop exit
PB: predicated region body
PF: predicated region fallthrough
CT: control target
= control target key end

     0   :  { %s740_s18 = smov 0   ;;  %s742_s19 = smov 0   ;;  %s876_s0 = inlined_call_operand.vmem [shape: f32[2,32,256], index: 0, kind: input, shape index: {}]   ;;  %s877_s1 = inlined_call_operand.vmem [shape: f32[32,32], index: 1, kind: input, shape index: {}]   ;;  %s878_s2 = inlined_call_operand.vmem [shape: f32[32,1], index: 2, kind: input, shape index: {}]   ;;  %s879_s3 = inlined_call_operand.vmem [shape: f32[32,1], index: 3, kind: input, shape index: {}]   ;;  %s880_s4 = inlined_call_operand.vmem [shape: f32[2,32,1], index: 4, kind: output, shape index: {0}]   ;;  %s881_s5 = inlined_call_operand.vmem [shape: f32[2,32,1], index: 5, kind: output, shape index: {1}]  }
   0x1   :  { %s744_s20 = smov 0  }
   0x2 LB: > { %s28_s21 = sadd.s32 1, %s702_s19  ;;  %p628_p0 = scmp.ge.s32.totalorder %s706_s20, 1  ;;  %s706_s20 = sphi %s744_s20, %s16_s20   ;;  %s702_s19 = sphi %s742_s19, %s883_s19   ;;  %s698_s18 = sphi %s740_s18, %s882_s18  }
   0x3   : > { %p30_p1 = scmp.ge.s32.totalorder %s28_s21, 2  ;;  %p209_p2 = scmp.lt.s32.totalorder %s706_s20, 3 }
   0x5   : > { %s885_s21 = smov (%p30_p1, %s28_s21), 0  ;;  %p210_p3 = pnand %p628_p0, %p209_p2 }
   0x6   : > { %v319_v0 = vld [vmem:[%s879_s3] sm:$0xff] (!%p210_p3)  ;;  %v708_v2 = vmov (!%p210_p3), 0   ;;  %v320_v3 = vld [vmem:[%s879_s3 + $0x8] sm:$0xff] (!%p210_p3)  ;;  %v290_v5 = vld [vmem:[%s878_s2 + $0x18] sm:$0xff] (!%p210_p3)  ;;  %v709_v9 = vmov (!%p210_p3), 0.0   ;;  %p247_p4 = scmp.lt.s32.totalorder (!%p210_p3), %s698_s18, 1 }
   0x7   : > { %213 = sbr.rel (%p210_p3) target bundleno = 534 (0x216), region = 36  ;;  %v287_v1 = vld [vmem:[%s878_s2] sm:$0xff] (!%p210_p3)  ;;  %683 = vset.pattern.permute.xlu1 (!%p210_p3), %v708_v2  ;;  %682 = vset.pattern.permute.xlu0 (!%p210_p3), %v708_v2  ;;  %v288_v4 = vld [vmem:[%s878_s2 + $0x8] sm:$0xff] (!%p210_p3)  ;;  %v289_v6 = vld [vmem:[%s878_s2 + $0x10] sm:$0xff] (!%p210_p3)  ;;  %vm363_vm0 = vcmask (!%p210_p3), 261120   ;;  %vm270_vm1 = vcmask (!%p210_p3), 7168  }
   0x8   : > { %325 = vperm.xlu1 (!%p210_p3), %683, %v319_v0   ;;  %293 = vperm.xlu0 (!%p210_p3), %682, %v287_v1   ;;  %v322_v7 = vld [vmem:[%s879_s3 + $0x18] sm:$0xff] (!%p210_p3)  ;;  %v321_v8 = vld [vmem:[%s879_s3 + $0x10] sm:$0xff] (!%p210_p3)  ;;  %v359_v54 = vld [vmem:[%s877_s1] sm:$0xff] (!%p210_p3) }
   0x9   : > { %440 = vmatprep.mubr.f32.mxu0 (!%p210_p3), %v709_v9  ;;  %452 = vmatprep.mubr.f32.mxu1 (!%p210_p3), %v709_v9  ;;  %v361_v55 = vld [vmem:[%s877_s1 + $0x10] sm:$0xff] (!%p210_p3)  ;;  %v360_v56 = vld [vmem:[%s877_s1 + $0x8] sm:$0xff] (!%p210_p3)  ;;  %v362_v57 = vld [vmem:[%s877_s1 + $0x18] sm:$0xff] (!%p210_p3) }
   0xc   : > { %330 = vperm.xlu1 (!%p210_p3), %683, %v320_v3   ;;  %298 = vperm.xlu0 (!%p210_p3), %682, %v288_v4  }
   0xe   : > { %s887_s18 = smov (!%p247_p4, %s698_s18), 1 }
   0xf   : > { %s641_s13 = sshll.u32 %s887_s18, 6  ;;  %s642_s29 = sshll.u32 %s887_s18, 5 }
  0x10   : > { %308 = vperm.xlu1 %683, %v290_v5   ;;  %303 = vperm.xlu0 %682, %v289_v6   ;;  %s254_s16 = scalar_lea.vmem %s876_s0, %s641_s13  ;;  %s812_s7 = scalar_lea.vmem %s880_s4, %s642_s29 }
  0x11   : > { %v279_v10 = vld [vmem:[%s254_s16] sm:$0xff]  ;;  %v280_v11 = vld [vmem:[%s254_s16 + $0x8] sm:$0xff]  ;;  %v281_v16 = vld [vmem:[%s254_s16 + $0x10] sm:$0xff]  ;;  %s817_s10 = scalar_lea.vmem %s881_s5, %s642_s29  ;;  %271 = vst.msk [vmem:[%s812_s7] sm:$0xff] %vm270_vm1, %v709_v9 }
  0x12   : > { %v282_v17 = vld [vmem:[%s254_s16 + $0x18] sm:$0xff]  ;;  %v285_v26 = vld [vmem:[%s254_s16 + $0x30] sm:$0xff]  ;;  %v283_v30 = vld [vmem:[%s254_s16 + $0x20] sm:$0xff]  ;;  %272 = vst.msk [vmem:[%s812_s7 + $0x8] sm:$0xff] %vm270_vm1, %v709_v9 }
  0x13   : > { %v286_v28 = vld [vmem:[%s254_s16 + $0x38] sm:$0xff]  ;;  %v284_v31 = vld [vmem:[%s254_s16 + $0x28] sm:$0xff]  ;;  %273 = vst.msk [vmem:[%s812_s7 + $0x10] sm:$0xff] %vm270_vm1, %v709_v9  ;;  %274 = vst.msk [vmem:[%s812_s7 + $0x18] sm:$0xff] %vm270_vm1, %v709_v9 }
  0x14   : > { %340 = vperm.xlu1 %683, %v322_v7   ;;  %335 = vperm.xlu0 %682, %v321_v8   ;;  %275 = vst.msk [vmem:[%s817_s10] sm:$0xff] %vm270_vm1, %v709_v9  ;;  %276 = vst.msk [vmem:[%s817_s10 + $0x8] sm:$0xff] %vm270_vm1, %v709_v9 }
  0x15   : > { %277 = vst.msk [vmem:[%s817_s10 + $0x10] sm:$0xff] %vm270_vm1, %v709_v9  ;;  %278 = vst.msk [vmem:[%s817_s10 + $0x18] sm:$0xff] %vm270_vm1, %v709_v9 }
  0x87   : > { %v326_v12 = vpop.permute.xlu1 %325  ;;  %v294_v13 = vpop.permute.xlu0 %293 }
  0x88   : > { %v311_v14 = vmul.f32 %v294_v13, %v279_v10  ;;  %v312_v15 = vmul.f32 %v294_v13, %v280_v11 }
  0x8a   : > { %v343_v22 = vadd.f32 %v326_v12, %v311_v14  ;;  %v344_v23 = vadd.f32 %v326_v12, %v312_v15 }
  0x8b   : > { %v331_v18 = vpop.permute.xlu1 %330  ;;  %v299_v19 = vpop.permute.xlu0 %298 }
  0x8c   : > { %v313_v20 = vmul.f32 %v299_v19, %v281_v16  ;;  %v314_v21 = vmul.f32 %v299_v19, %v282_v17  ;;  %v352_v32 = vmax.f32 %v344_v23, 0.0  ;;  %v351_v34 = vmax.f32 %v343_v22, 0.0  ;;  %v467_v23 = vld [vmem:[%s812_s7 + $0x10] sm:$0xff] }
  0x8e   : > { %v345_v24 = vadd.f32 %v331_v18, %v313_v20  ;;  %v346_v25 = vadd.f32 %v331_v18, %v314_v21  ;;  %v465_v18 = vld [vmem:[%s812_s7] sm:$0xff] }
  0x8f   : > { %v309_v27 = vpop.permute.xlu1 %308  ;;  %v304_v29 = vpop.permute.xlu0 %303  ;;  %v490_v20 = vld [vmem:[%s817_s10] sm:$0xff] }
  0x90   : > { %v354_v33 = vmax.f32 %v346_v25, 0.0  ;;  %v353_v35 = vmax.f32 %v345_v24, 0.0  ;;  %v317_v36 = vmul.f32 %v309_v27, %v285_v26  ;;  %v318_v37 = vmul.f32 %v309_v27, %v286_v28  ;;  %v466_v26 = vld [vmem:[%s812_s7 + $0x8] sm:$0xff] }
  0x91   : > { %v315_v38 = vmul.f32 %v304_v29, %v283_v30  ;;  %v316_v39 = vmul.f32 %v304_v29, %v284_v31  ;;  %v468_v29 = vld [vmem:[%s812_s7 + $0x18] sm:$0xff] }
  0x92   : > { %v644_v42 = vpack.c.bf16 %v354_v33, %v352_v32  ;;  %v646_v43 = vpack.c.bf16 %v353_v35, %v351_v34  ;;  %v492_v32 = vld [vmem:[%s817_s10 + $0x10] sm:$0xff]  ;;  %v491_v35 = vld [vmem:[%s817_s10 + $0x8] sm:$0xff] }
  0x93   : > { %v341_v40 = vpop.permute.xlu1 %340  ;;  %v336_v41 = vpop.permute.xlu0 %335 }
  0x94   : > { %v349_v44 = vadd.f32 %v341_v40, %v317_v36  ;;  %v350_v45 = vadd.f32 %v341_v40, %v318_v37  ;;  %v347_v46 = vadd.f32 %v336_v41, %v315_v38  ;;  %v348_v47 = vadd.f32 %v336_v41, %v316_v39  ;;  %645 = vmatprep.subr.bf16.mxu0 %v644_v42  ;;  %v493_v39 = vld [vmem:[%s817_s10 + $0x18] sm:$0xff] }
  0x95   : > { %652 = vmatprep.subr.bf16.mxu1 %v644_v42  ;;  %647 = vmatpush1.bf16.msra.mxu0 %v646_v43 }
  0x96   : > { %v357_v48 = vmax.f32 %v349_v44, 0.0  ;;  %v358_v49 = vmax.f32 %v350_v45, 0.0  ;;  %v355_v50 = vmax.f32 %v347_v46, 0.0  ;;  %v356_v51 = vmax.f32 %v348_v47, 0.0  ;;  %654 = vmatpush1.bf16.msra.mxu1 %v646_v43 }
  0x98   : > { %v648_v52 = vpack.c.bf16 %v358_v49, %v356_v51  ;;  %v650_v53 = vpack.c.bf16 %v357_v48, %v355_v50 }
  0x9a   : > { %649 = vmatprep.subr.bf16.mxu0 %v648_v52  ;;  %653 = vmatprep.subr.bf16.mxu1 %v648_v52 }
  0x9b   : > { %651 = vmatpush1.bf16.msra.mxu0 %v650_v53  ;;  %655 = vmatpush1.bf16.msra.mxu1 %v650_v53 }
  0x9e   : > { %635 = vmatmul.mubr.msk.f32.vlgmr.msra.gmra.mrb[0].mxu0 %vm363_vm0, %v359_v54  ;;  %637 = vmatmul.mubr.msk.f32.vlgmr.msra.gmra.mrb[0].mxu1 %vm363_vm0, %v361_v55 }
  0x9f   : > { %446 = vmatprep.mubr.f32.mxu0 %v709_v9  ;;  %458 = vmatprep.mubr.f32.mxu1 %v709_v9 }
  0xa2   : > { %636 = vmatmul.mubr.msk.f32.gmra.mrb[2].mxu0 %vm363_vm0, %v360_v56  ;;  %638 = vmatmul.mubr.msk.f32.gmra.mrb[2].mxu1 %vm363_vm0, %v362_v57 }
 0x171   : > { %v442_v58 = vpop.f32.mrb[0].mxu0  ;;  %v454_v59 = vpop.f32.mrb[0].mxu1 }
 0x172   : > { %v494_v60 = vmul.f32 %v442_v58, %v442_v58  ;;  %v444_v61 = vpop.f32.mrb[1].mxu0  ;;  %v498_v62 = vmul.f32 %v454_v59, %v454_v59  ;;  %v456_v63 = vpop.f32.mrb[1].mxu1 }
 0x173   : > { %v495_v0 = vmul.f32 %v444_v61, %v444_v61  ;;  %v499_v1 = vmul.f32 %v456_v63, %v456_v63  ;;  %v469_v2 = vadd.f32 %v444_v61, %v442_v58  ;;  %v475_v3 = vadd.f32 %v456_v63, %v454_v59 }
 0x175   : > { %470 = vadd.xlane.f32.xlu0 %v469_v2  ;;  %v502_v4 = vadd.f32 %v495_v0, %v494_v60  ;;  %v448_v5 = vpop.f32.mrb[2].mxu0  ;;  %v460_v6 = vpop.f32.mrb[2].mxu1  ;;  %v508_v7 = vadd.f32 %v499_v1, %v498_v62 }
 0x176   : > { %v496_v8 = vmul.f32 %v448_v5, %v448_v5  ;;  %v450_v10 = vpop.f32.mrb[3].mxu0  ;;  %v500_v11 = vmul.f32 %v460_v6, %v460_v6  ;;  %v462_v9 = vpop.f32.mrb[3].mxu1 }
 0x177   : > { %503 = vadd.xlane.f32.xlu1 %v502_v4  ;;  %v472_v12 = vadd.f32 %v450_v10, %v448_v5  ;;  %v497_v13 = vmul.f32 %v450_v10, %v450_v10  ;;  %v478_v14 = vadd.f32 %v462_v9, %v460_v6  ;;  %v501_v15 = vmul.f32 %v462_v9, %v462_v9 }
 0x179   : > { %476 = vadd.xlane.f32.xlu0 %v475_v3  ;;  %v505_v16 = vadd.f32 %v497_v13, %v496_v8  ;;  %v511_v17 = vadd.f32 %v501_v15, %v500_v11 }
 0x17b   : > { %473 = vadd.xlane.f32.xlu1 %v472_v12 }
 0x17d   : > { %479 = vadd.xlane.f32.xlu0 %v478_v14 }
 0x17f   : > { %509 = vadd.xlane.f32.xlu1 %v508_v7 }
 0x181   : > { %506 = vadd.xlane.f32.xlu0 %v505_v16 }
 0x185   : > { %512 = vadd.xlane.f32.xlu0 %v511_v17 }
 0x202   : > { %v471_v19 = vpop.xlane.xlu0 %470 }
 0x203   : > { %v481_v21 = vadd.f32 %v471_v19, %v465_v18 }
 0x204   : > { %v504_v22 = vpop.xlane.xlu1 %503 }
 0x205   : > { %486 = vst.msk [vmem:[%s812_s7] sm:$0xff] %vm270_vm1, %v481_v21  ;;  %v514_v24 = vadd.f32 %v504_v22, %v490_v20 }
 0x206   : > { %v477_v25 = vpop.xlane.xlu0 %476 }
 0x207   : > { %518 = vst.msk [vmem:[%s817_s10] sm:$0xff] %vm270_vm1, %v514_v24  ;;  %v483_v27 = vadd.f32 %v477_v25, %v467_v23 }
 0x208   : > { %v474_v28 = vpop.xlane.xlu1 %473 }
 0x209   : > { %488 = vst.msk [vmem:[%s812_s7 + $0x10] sm:$0xff] %vm270_vm1, %v483_v27  ;;  %v482_v30 = vadd.f32 %v474_v28, %v466_v26 }
 0x20a   : > { %v480_v31 = vpop.xlane.xlu0 %479 }
 0x20b   : > { %487 = vst.msk [vmem:[%s812_s7 + $0x8] sm:$0xff] %vm270_vm1, %v482_v30  ;;  %v484_v33 = vadd.f32 %v480_v31, %v468_v29 }
 0x20c   : > { %v510_v34 = vpop.xlane.xlu1 %509 }
 0x20d   : > { %489 = vst.msk [vmem:[%s812_s7 + $0x18] sm:$0xff] %vm270_vm1, %v484_v33  ;;  %v516_v36 = vadd.f32 %v510_v34, %v492_v32 }
 0x20e   : > { %v507_v37 = vpop.xlane.xlu0 %506 }
 0x20f   : > { %520 = vst.msk [vmem:[%s817_s10 + $0x10] sm:$0xff] %vm270_vm1, %v516_v36  ;;  %v515_v38 = vadd.f32 %v507_v37, %v491_v35 }
 0x211   : > { %519 = vst.msk [vmem:[%s817_s10 + $0x8] sm:$0xff] %vm270_vm1, %v515_v38 }
 0x212   : > { %v513_v40 = vpop.xlane.xlu0 %512 }
 0x213   : > { %v517_v41 = vadd.f32 %v513_v40, %v493_v39 }
 0x215   : > { %521 = vst.msk [vmem:[%s817_s10 + $0x18] sm:$0xff] %vm270_vm1, %v517_v41 }
 0x216 PF: > { %s16_s20 = sadd.s32 1, %s706_s20   ;;  %s882_s18 = smov %s702_s19 }
 0x217   : > { %p13_p5 = scmp.ge.s32.totalorder %s16_s20, 4   ;;  %s883_s19 = smov %s885_s21 }
 0x219   :  { %15 = sbr.rel (!%p13_p5) target bundleno = 2 (0x2), region = 82 }

// kernel: projector_c_forward.5
= control target key start
LH: loop header
LB: loop body
LE: loop exit
PB: predicated region body
PF: predicated region fallthrough
CT: control target
= control target key end

     0   :  { %s857_s21 = smov 0   ;;  %s859_s22 = smov 0   ;;  %s1004_s0 = inlined_call_operand.vmem [shape: f32[2,32,256], index: 0, kind: input, shape index: {}, may-alias: {0,4}]   ;;  %s1005_s1 = inlined_call_operand.vmem [shape: f32[32,32], index: 1, kind: input, shape index: {}]   ;;  %s1006_s2 = inlined_call_operand.vmem [shape: f32[32,1], index: 2, kind: input, shape index: {}]   ;;  %s1007_s3 = inlined_call_operand.vmem [shape: f32[32,1], index: 3, kind: input, shape index: {}]   ;;  %s1008_s4 = inlined_call_operand.vmem [shape: f32[2,32,256], index: 4, kind: output, shape index: {0}, may-alias: {0,4}]   ;;  %s1009_s5 = inlined_call_operand.vmem [shape: f32[2,32,1], index: 5, kind: output, shape index: {1}]   ;;  %s1010_s6 = inlined_call_operand.vmem [shape: f32[2,32,1], index: 6, kind: output, shape index: {2}]  }
   0x1   :  { %s861_s23 = smov 0  }
   0x2 LB: > { %s29_s24 = sadd.s32 1, %s814_s22  ;;  %p737_p0 = scmp.ge.s32.totalorder %s818_s23, 1  ;;  %s818_s23 = sphi %s861_s23, %s17_s23   ;;  %s814_s22 = sphi %s859_s22, %s1012_s22   ;;  %s810_s21 = sphi %s857_s21, %s1011_s21  }
   0x3   : > { %p31_p1 = scmp.ge.s32.totalorder %s29_s24, 2  ;;  %p238_p2 = scmp.lt.s32.totalorder %s818_s23, 3 }
   0x5   : > { %s1014_s24 = smov (%p31_p1, %s29_s24), 0  ;;  %p239_p3 = pnand %p737_p0, %p238_p2 }
   0x6   : > { %v369_v0 = vld [vmem:[%s1007_s3] sm:$0xff] (!%p239_p3)  ;;  %v820_v2 = vmov (!%p239_p3), 0   ;;  %v370_v3 = vld [vmem:[%s1007_s3 + $0x8] sm:$0xff] (!%p239_p3)  ;;  %v340_v5 = vld [vmem:[%s1006_s2 + $0x18] sm:$0xff] (!%p239_p3)  ;;  %v821_v9 = vmov (!%p239_p3), 0.0   ;;  %p287_p4 = scmp.lt.s32.totalorder (!%p239_p3), %s810_s21, 1 }
   0x7   : > { %242 = sbr.rel (%p239_p3) target bundleno = 534 (0x216), region = 36  ;;  %v337_v1 = vld [vmem:[%s1006_s2] sm:$0xff] (!%p239_p3)  ;;  %795 = vset.pattern.permute.xlu1 (!%p239_p3), %v820_v2  ;;  %794 = vset.pattern.permute.xlu0 (!%p239_p3), %v820_v2  ;;  %v338_v4 = vld [vmem:[%s1006_s2 + $0x8] sm:$0xff] (!%p239_p3)  ;;  %v339_v6 = vld [vmem:[%s1006_s2 + $0x10] sm:$0xff] (!%p239_p3)  ;;  %vm413_vm0 = vcmask (!%p239_p3), 261120   ;;  %vm320_vm1 = vcmask (!%p239_p3), 7168  }
   0x8   : > { %375 = vperm.xlu1 (!%p239_p3), %795, %v369_v0   ;;  %343 = vperm.xlu0 (!%p239_p3), %794, %v337_v1   ;;  %v372_v7 = vld [vmem:[%s1007_s3 + $0x18] sm:$0xff] (!%p239_p3)  ;;  %v371_v8 = vld [vmem:[%s1007_s3 + $0x10] sm:$0xff] (!%p239_p3)  ;;  %v409_v54 = vld [vmem:[%s1005_s1] sm:$0xff] (!%p239_p3) }
   0x9   : > { %490 = vmatprep.mubr.f32.mxu0 (!%p239_p3), %v821_v9  ;;  %502 = vmatprep.mubr.f32.mxu1 (!%p239_p3), %v821_v9  ;;  %v411_v55 = vld [vmem:[%s1005_s1 + $0x10] sm:$0xff] (!%p239_p3)  ;;  %v410_v56 = vld [vmem:[%s1005_s1 + $0x8] sm:$0xff] (!%p239_p3)  ;;  %v412_v57 = vld [vmem:[%s1005_s1 + $0x18] sm:$0xff] (!%p239_p3) }
   0xc   : > { %380 = vperm.xlu1 (!%p239_p3), %795, %v370_v3   ;;  %348 = vperm.xlu0 (!%p239_p3), %794, %v338_v4  }
   0xe   : > { %s1016_s21 = smov (!%p287_p4, %s810_s21), 1 }
   0xf   : > { %s752_s17 = sshll.u32 %s1016_s21, 6  ;;  %s754_s9 = sshll.u32 %s1016_s21, 5 }
  0x10   : > { %358 = vperm.xlu1 %795, %v340_v5   ;;  %353 = vperm.xlu0 %794, %v339_v6   ;;  %s294_s20 = scalar_lea.vmem %s1004_s0, %s752_s17  ;;  %s933_s12 = scalar_lea.vmem %s1009_s5, %s754_s9 }
  0x11   : > { %v329_v10 = vld [vmem:[%s294_s20] sm:$0xff]  ;;  %v330_v11 = vld [vmem:[%s294_s20 + $0x8] sm:$0xff]  ;;  %v331_v16 = vld [vmem:[%s294_s20 + $0x10] sm:$0xff]  ;;  %321 = vst.msk [vmem:[%s933_s12] sm:$0xff] %vm320_vm1, %v821_v9  ;;  %s304_s15 = scalar_lea.vmem %s1008_s4, %s752_s17  ;;  %s957_s18 = scalar_lea.vmem %s1010_s6, %s754_s9 }
  0x12   : > { %v332_v17 = vld [vmem:[%s294_s20 + $0x18] sm:$0xff]  ;;  %v335_v26 = vld [vmem:[%s294_s20 + $0x30] sm:$0xff]  ;;  %v333_v30 = vld [vmem:[%s294_s20 + $0x20] sm:$0xff]  ;;  %322 = vst.msk [vmem:[%s933_s12 + $0x8] sm:$0xff] %vm320_vm1, %v821_v9 }
  0x13   : > { %v336_v28 = vld [vmem:[%s294_s20 + $0x38] sm:$0xff]  ;;  %v334_v31 = vld [vmem:[%s294_s20 + $0x28] sm:$0xff]  ;;  %323 = vst.msk [vmem:[%s933_s12 + $0x10] sm:$0xff] %vm320_vm1, %v821_v9  ;;  %324 = vst.msk [vmem:[%s933_s12 + $0x18] sm:$0xff] %vm320_vm1, %v821_v9 }
  0x14   : > { %390 = vperm.xlu1 %795, %v372_v7   ;;  %385 = vperm.xlu0 %794, %v371_v8   ;;  %325 = vst.msk [vmem:[%s957_s18] sm:$0xff] %vm320_vm1, %v821_v9  ;;  %326 = vst.msk [vmem:[%s957_s18 + $0x8] sm:$0xff] %vm320_vm1, %v821_v9 }
  0x15   : > { %327 = vst.msk [vmem:[%s957_s18 + $0x10] sm:$0xff] %vm320_vm1, %v821_v9  ;;  %328 = vst.msk [vmem:[%s957_s18 + $0x18] sm:$0xff] %vm320_vm1, %v821_v9 }
  0x87   : > { %v376_v12 = vpop.permute.xlu1 %375  ;;  %v344_v13 = vpop.permute.xlu0 %343 }
  0x88   : > { %v361_v14 = vmul.f32 %v344_v13, %v329_v10  ;;  %v362_v15 = vmul.f32 %v344_v13, %v330_v11 }
  0x8a   : > { %v393_v22 = vadd.f32 %v376_v12, %v361_v14  ;;  %v394_v23 = vadd.f32 %v376_v12, %v362_v15 }
  0x8b   : > { %v381_v18 = vpop.permute.xlu1 %380  ;;  %v349_v19 = vpop.permute.xlu0 %348 }
  0x8c   : > { %v363_v20 = vmul.f32 %v349_v19, %v331_v16  ;;  %v364_v21 = vmul.f32 %v349_v19, %v332_v17  ;;  %v402_v32 = vmax.f32 %v394_v23, 0.0  ;;  %v401_v34 = vmax.f32 %v393_v22, 0.0  ;;  %v523_v19 = vld [vmem:[%s933_s12] sm:$0xff] }
  0x8e   : > { %v395_v24 = vadd.f32 %v381_v18, %v363_v20  ;;  %v396_v25 = vadd.f32 %v381_v18, %v364_v21  ;;  %v548_v21 = vld [vmem:[%s957_s18] sm:$0xff] }
  0x8f   : > { %v359_v27 = vpop.permute.xlu1 %358  ;;  %v354_v29 = vpop.permute.xlu0 %353 }
  0x90   : > { %v404_v33 = vmax.f32 %v396_v25, 0.0  ;;  %v403_v35 = vmax.f32 %v395_v24, 0.0  ;;  %v367_v36 = vmul.f32 %v359_v27, %v335_v26  ;;  %v368_v37 = vmul.f32 %v359_v27, %v336_v28  ;;  %v525_v24 = vld [vmem:[%s933_s12 + $0x10] sm:$0xff] }
  0x91   : > { %v365_v38 = vmul.f32 %v354_v29, %v333_v30  ;;  %v366_v39 = vmul.f32 %v354_v29, %v334_v31  ;;  %v526_v29 = vld [vmem:[%s933_s12 + $0x18] sm:$0xff] }
  0x92   : > { %v756_v42 = vpack.c.bf16 %v404_v33, %v402_v32  ;;  %v758_v43 = vpack.c.bf16 %v403_v35, %v401_v34  ;;  %v550_v32 = vld [vmem:[%s957_s18 + $0x10] sm:$0xff]  ;;  %v549_v35 = vld [vmem:[%s957_s18 + $0x8] sm:$0xff] }
  0x93   : > { %v391_v40 = vpop.permute.xlu1 %390  ;;  %v386_v41 = vpop.permute.xlu0 %385 }
  0x94   : > { %v399_v44 = vadd.f32 %v391_v40, %v367_v36  ;;  %v400_v45 = vadd.f32 %v391_v40, %v368_v37  ;;  %v397_v46 = vadd.f32 %v386_v41, %v365_v38  ;;  %v398_v47 = vadd.f32 %v386_v41, %v366_v39  ;;  %757 = vmatprep.subr.bf16.mxu0 %v756_v42  ;;  %v551_v39 = vld [vmem:[%s957_s18 + $0x18] sm:$0xff] }
  0x95   : > { %764 = vmatprep.subr.bf16.mxu1 %v756_v42  ;;  %759 = vmatpush1.bf16.msra.mxu0 %v758_v43 }
  0x96   : > { %v407_v48 = vmax.f32 %v399_v44, 0.0  ;;  %v408_v49 = vmax.f32 %v400_v45, 0.0  ;;  %v405_v50 = vmax.f32 %v397_v46, 0.0  ;;  %v406_v51 = vmax.f32 %v398_v47, 0.0  ;;  %766 = vmatpush1.bf16.msra.mxu1 %v758_v43 }
  0x98   : > { %v760_v52 = vpack.c.bf16 %v408_v49, %v406_v51  ;;  %v762_v53 = vpack.c.bf16 %v407_v48, %v405_v50 }
  0x9a   : > { %761 = vmatprep.subr.bf16.mxu0 %v760_v52  ;;  %765 = vmatprep.subr.bf16.mxu1 %v760_v52 }
  0x9b   : > { %763 = vmatpush1.bf16.msra.mxu0 %v762_v53  ;;  %767 = vmatpush1.bf16.msra.mxu1 %v762_v53 }
  0x9e   : > { %746 = vmatmul.mubr.msk.f32.vlgmr.msra.gmra.mrb[0].mxu0 %vm413_vm0, %v409_v54  ;;  %748 = vmatmul.mubr.msk.f32.vlgmr.msra.gmra.mrb[0].mxu1 %vm413_vm0, %v411_v55 }
  0x9f   : > { %496 = vmatprep.mubr.f32.mxu0 %v821_v9  ;;  %508 = vmatprep.mubr.f32.mxu1 %v821_v9  ;;  %v524_v9 = vld [vmem:[%s933_s12 + $0x8] sm:$0xff] }
  0xa2   : > { %747 = vmatmul.mubr.msk.f32.gmra.mrb[2].mxu0 %vm413_vm0, %v410_v56  ;;  %749 = vmatmul.mubr.msk.f32.gmra.mrb[2].mxu1 %vm413_vm0, %v412_v57 }
 0x171   : > { %v492_v58 = vpop.f32.mrb[0].mxu0  ;;  %v504_v59 = vpop.f32.mrb[0].mxu1 }
 0x172   : > { %515 = vst [vmem:[%s304_s15] sm:$0xff] %v492_v58  ;;  %v494_v60 = vpop.f32.mrb[1].mxu0  ;;  %519 = vst [vmem:[%s304_s15 + $0x20] sm:$0xff] %v504_v59  ;;  %v506_v61 = vpop.f32.mrb[1].mxu1  ;;  %v552_v62 = vmul.f32 %v492_v58, %v492_v58  ;;  %v556_v63 = vmul.f32 %v504_v59, %v504_v59 }
 0x173   : > { %516 = vst [vmem:[%s304_s15 + $0x8] sm:$0xff] %v494_v60  ;;  %520 = vst [vmem:[%s304_s15 + $0x28] sm:$0xff] %v506_v61  ;;  %v527_v0 = vadd.f32 %v494_v60, %v492_v58  ;;  %v553_v1 = vmul.f32 %v494_v60, %v494_v60  ;;  %v533_v2 = vadd.f32 %v506_v61, %v504_v59 }
 0x174   : > { %v557_v3 = vmul.f32 %v506_v61, %v506_v61 }
 0x175   : > { %528 = vadd.xlane.f32.xlu0 %v527_v0  ;;  %v560_v4 = vadd.f32 %v553_v1, %v552_v62  ;;  %v498_v5 = vpop.f32.mrb[2].mxu0  ;;  %v510_v6 = vpop.f32.mrb[2].mxu1 }
 0x176   : > { %v566_v7 = vadd.f32 %v557_v3, %v556_v63  ;;  %517 = vst [vmem:[%s304_s15 + $0x10] sm:$0xff] %v498_v5  ;;  %v500_v8 = vpop.f32.mrb[3].mxu0  ;;  %521 = vst [vmem:[%s304_s15 + $0x30] sm:$0xff] %v510_v6  ;;  %v512_v10 = vpop.f32.mrb[3].mxu1  ;;  %v554_v11 = vmul.f32 %v498_v5, %v498_v5  ;;  %v558_v12 = vmul.f32 %v510_v6, %v510_v6 }
 0x177   : > { %561 = vadd.xlane.f32.xlu1 %v560_v4  ;;  %518 = vst [vmem:[%s304_s15 + $0x18] sm:$0xff] %v500_v8  ;;  %v555_v13 = vmul.f32 %v500_v8, %v500_v8  ;;  %522 = vst [vmem:[%s304_s15 + $0x38] sm:$0xff] %v512_v10  ;;  %v559_v14 = vmul.f32 %v512_v10, %v512_v10  ;;  %v530_v15 = vadd.f32 %v500_v8, %v498_v5 }
 0x178   : > { %v536_v16 = vadd.f32 %v512_v10, %v510_v6 }
 0x179   : > { %534 = vadd.xlane.f32.xlu0 %v533_v2  ;;  %v563_v17 = vadd.f32 %v555_v13, %v554_v11  ;;  %v569_v18 = vadd.f32 %v559_v14, %v558_v12 }
 0x17b   : > { %531 = vadd.xlane.f32.xlu1 %v530_v15 }
 0x17d   : > { %537 = vadd.xlane.f32.xlu0 %v536_v16 }
 0x17f   : > { %567 = vadd.xlane.f32.xlu1 %v566_v7 }
 0x181   : > { %564 = vadd.xlane.f32.xlu0 %v563_v17 }
 0x185   : > { %570 = vadd.xlane.f32.xlu0 %v569_v18 }
 0x202   : > { %v529_v20 = vpop.xlane.xlu0 %528 }
 0x203   : > { %v539_v22 = vadd.f32 %v529_v20, %v523_v19 }
 0x204   : > { %v562_v23 = vpop.xlane.xlu1 %561 }
 0x205   : > { %544 = vst.msk [vmem:[%s933_s12] sm:$0xff] %vm320_vm1, %v539_v22  ;;  %v572_v25 = vadd.f32 %v562_v23, %v548_v21 }
 0x206   : > { %v535_v26 = vpop.xlane.xlu0 %534 }
 0x207   : > { %576 = vst.msk [vmem:[%s957_s18] sm:$0xff] %vm320_vm1, %v572_v25  ;;  %v541_v27 = vadd.f32 %v535_v26, %v525_v24 }
 0x208   : > { %v532_v28 = vpop.xlane.xlu1 %531 }
 0x209   : > { %546 = vst.msk [vmem:[%s933_s12 + $0x10] sm:$0xff] %vm320_vm1, %v541_v27  ;;  %v540_v30 = vadd.f32 %v532_v28, %v524_v9 }
 0x20a   : > { %v538_v31 = vpop.xlane.xlu0 %537 }
 0x20b   : > { %545 = vst.msk [vmem:[%s933_s12 + $0x8] sm:$0xff] %vm320_vm1, %v540_v30  ;;  %v542_v33 = vadd.f32 %v538_v31, %v526_v29 }
 0x20c   : > { %v568_v34 = vpop.xlane.xlu1 %567 }
 0x20d   : > { %547 = vst.msk [vmem:[%s933_s12 + $0x18] sm:$0xff] %vm320_vm1, %v542_v33  ;;  %v574_v36 = vadd.f32 %v568_v34, %v550_v32 }
 0x20e   : > { %v565_v37 = vpop.xlane.xlu0 %564 }
 0x20f   : > { %578 = vst.msk [vmem:[%s957_s18 + $0x10] sm:$0xff] %vm320_vm1, %v574_v36  ;;  %v573_v38 = vadd.f32 %v565_v37, %v549_v35 }
 0x211   : > { %577 = vst.msk [vmem:[%s957_s18 + $0x8] sm:$0xff] %vm320_vm1, %v573_v38 }
 0x212   : > { %v571_v40 = vpop.xlane.xlu0 %570 }
 0x213   : > { %v575_v41 = vadd.f32 %v571_v40, %v551_v39 }
 0x215   : > { %579 = vst.msk [vmem:[%s957_s18 + $0x18] sm:$0xff] %vm320_vm1, %v575_v41 }
 0x216 PF: > { %s17_s23 = sadd.s32 1, %s818_s23   ;;  %s1011_s21 = smov %s814_s22 }
 0x217   : > { %p14_p5 = scmp.ge.s32.totalorder %s17_s23, 4   ;;  %s1012_s22 = smov %s1014_s24 }
 0x219   :  { %16 = sbr.rel (!%p14_p5) target bundleno = 2 (0x2), region = 94 }

// kernel: projector_c_forward.7
= control target key start
LH: loop header
LB: loop body
LE: loop exit
PB: predicated region body
PF: predicated region fallthrough
CT: control target
= control target key end

     0   :  { %s754_s21 = smov 0   ;;  %s756_s22 = smov 0   ;;  %s862_s0 = inlined_call_operand.vmem [shape: f32[2,32,256], index: 0, kind: input, shape index: {}, may-alias: {0,6}]   ;;  %s863_s1 = inlined_call_operand.vmem [shape: f32[32,32], index: 1, kind: input, shape index: {}]   ;;  %s864_s2 = inlined_call_operand.vmem [shape: f32[32,1], index: 2, kind: input, shape index: {}]   ;;  %s865_s3 = inlined_call_operand.vmem [shape: f32[32,1], index: 3, kind: input, shape index: {}]   ;;  %s866_s4 = inlined_call_operand.vmem [shape: f32[32,1], index: 4, kind: input, shape index: {}]   ;;  %s867_s5 = inlined_call_operand.vmem [shape: f32[32,1], index: 5, kind: input, shape index: {}]   ;;  %s868_s6 = inlined_call_operand.vmem [shape: f32[2,32,256], index: 6, kind: output, shape index: {}, may-alias: {0,6}]  }
   0x1   :  { %s758_s23 = smov 0  }
   0x2 LB: > { %s28_s24 = sadd.s32 1, %s711_s22  ;;  %p640_p0 = scmp.ge.s32.totalorder %s715_s23, 1  ;;  %s715_s23 = sphi %s758_s23, %s16_s23   ;;  %s711_s22 = sphi %s756_s22, %s870_s22   ;;  %s707_s21 = sphi %s754_s21, %s869_s21  }
   0x3   : > { %p30_p1 = scmp.ge.s32.totalorder %s28_s24, 2  ;;  %p233_p2 = scmp.lt.s32.totalorder %s715_s23, 3 }
   0x5   : > { %s872_s24 = smov (%p30_p1, %s28_s24), 0  ;;  %p234_p3 = pnand %p640_p0, %p233_p2 }
   0x6   : > { %v331_v0 = vld [vmem:[%s865_s3] sm:$0xff] (!%p234_p3)  ;;  %v717_v2 = vmov (!%p234_p3), 0   ;;  %v332_v3 = vld [vmem:[%s865_s3 + $0x8] sm:$0xff] (!%p234_p3)  ;;  %v302_v5 = vld [vmem:[%s864_s2 + $0x18] sm:$0xff] (!%p234_p3)  ;;  %v718_v15 = vmov (!%p234_p3), 0.0   ;;  %p272_p4 = scmp.lt.s32.totalorder (!%p234_p3), %s707_s21, 1 }
   0x7   : > { %237 = sbr.rel (%p234_p3) target bundleno = 380 (0x17c), region = 44  ;;  %v299_v1 = vld [vmem:[%s864_s2] sm:$0xff] (!%p234_p3)  ;;  %692 = vset.pattern.permute.xlu1 (!%p234_p3), %v717_v2  ;;  %691 = vset.pattern.permute.xlu0 (!%p234_p3), %v717_v2  ;;  %v300_v4 = vld [vmem:[%s864_s2 + $0x8] sm:$0xff] (!%p234_p3)  ;;  %v301_v6 = vld [vmem:[%s864_s2 + $0x10] sm:$0xff] (!%p234_p3)  ;;  %vm375_vm0 = vcmask (!%p234_p3), 261120  }
   0x8   : > { %337 = vperm.xlu1 (!%p234_p3), %692, %v331_v0   ;;  %305 = vperm.xlu0 (!%p234_p3), %691, %v299_v1   ;;  %v334_v7 = vld [vmem:[%s865_s3 + $0x18] sm:$0xff] (!%p234_p3)  ;;  %v333_v8 = vld [vmem:[%s865_s3 + $0x10] sm:$0xff] (!%p234_p3)  ;;  %v478_v9 = vld [vmem:[%s866_s4 + $0x8] sm:$0xff] (!%p234_p3) }
   0x9   : > { %v477_v10 = vld [vmem:[%s866_s4] sm:$0xff] (!%p234_p3)  ;;  %v480_v11 = vld [vmem:[%s866_s4 + $0x18] sm:$0xff] (!%p234_p3)  ;;  %v479_v12 = vld [vmem:[%s866_s4 + $0x10] sm:$0xff] (!%p234_p3)  ;;  %452 = vmatprep.mubr.f32.mxu0 (!%p234_p3), %v718_v15  ;;  %464 = vmatprep.mubr.f32.mxu1 (!%p234_p3), %v718_v15 }
   0xa   : > { %v510_v13 = vld [vmem:[%s867_s5 + $0x8] sm:$0xff] (!%p234_p3)  ;;  %v509_v14 = vld [vmem:[%s867_s5] sm:$0xff] (!%p234_p3)  ;;  %v512_v16 = vld [vmem:[%s867_s5 + $0x18] sm:$0xff] (!%p234_p3) }
   0xb   : > { %v511_v17 = vld [vmem:[%s867_s5 + $0x10] sm:$0xff] (!%p234_p3)  ;;  %v371_v62 = vld [vmem:[%s863_s1] sm:$0xff] (!%p234_p3)  ;;  %v372_v0 = vld [vmem:[%s863_s1 + $0x8] sm:$0xff] (!%p234_p3) }
   0xc   : > { %342 = vperm.xlu1 (!%p234_p3), %692, %v332_v3   ;;  %310 = vperm.xlu0 (!%p234_p3), %691, %v300_v4   ;;  %v373_v63 = vld [vmem:[%s863_s1 + $0x10] sm:$0xff] (!%p234_p3)  ;;  %v374_v1 = vld [vmem:[%s863_s1 + $0x18] sm:$0xff] (!%p234_p3) }
   0xe   : > { %s874_s21 = smov (!%p272_p4, %s707_s21), 1 }
   0xf   : > { %s651_s13 = sshll.u32 %s874_s21, 6 }
  0x10   : > { %320 = vperm.xlu1 %692, %v302_v5   ;;  %315 = vperm.xlu0 %691, %v301_v6   ;;  %s279_s16 = scalar_lea.vmem %s862_s0, %s651_s13  ;;  %s289_s7 = scalar_lea.vmem %s868_s6, %s651_s13 }
  0x11   : > { %v291_v18 = vld [vmem:[%s279_s16] sm:$0xff]  ;;  %v292_v19 = vld [vmem:[%s279_s16 + $0x8] sm:$0xff]  ;;  %v293_v24 = vld [vmem:[%s279_s16 + $0x10] sm:$0xff] }
  0x12   : > { %v294_v25 = vld [vmem:[%s279_s16 + $0x18] sm:$0xff]  ;;  %v297_v34 = vld [vmem:[%s279_s16 + $0x30] sm:$0xff]  ;;  %v295_v38 = vld [vmem:[%s279_s16 + $0x20] sm:$0xff] }
  0x13   : > { %v298_v36 = vld [vmem:[%s279_s16 + $0x38] sm:$0xff]  ;;  %v296_v39 = vld [vmem:[%s279_s16 + $0x28] sm:$0xff] }
  0x14   : > { %352 = vperm.xlu1 %692, %v334_v7   ;;  %347 = vperm.xlu0 %691, %v333_v8  }
  0x18   : > { %488 = vperm.xlu1 %692, %v478_v9   ;;  %483 = vperm.xlu0 %691, %v477_v10  }
  0x1c   : > { %498 = vperm.xlu1 %692, %v480_v11   ;;  %493 = vperm.xlu0 %691, %v479_v12  }
  0x20   : > { %520 = vperm.xlu1 %692, %v510_v13   ;;  %515 = vperm.xlu0 %691, %v509_v14  }
  0x24   : > { %530 = vperm.xlu1 %692, %v512_v16   ;;  %525 = vperm.xlu0 %691, %v511_v17  }
  0x87   : > { %v338_v20 = vpop.permute.xlu1 %337  ;;  %v306_v21 = vpop.permute.xlu0 %305 }
  0x88   : > { %v323_v22 = vmul.f32 %v306_v21, %v291_v18  ;;  %v324_v23 = vmul.f32 %v306_v21, %v292_v19 }
  0x8a   : > { %v355_v30 = vadd.f32 %v338_v20, %v323_v22  ;;  %v356_v31 = vadd.f32 %v338_v20, %v324_v23 }
  0x8b   : > { %v343_v26 = vpop.permute.xlu1 %342  ;;  %v311_v27 = vpop.permute.xlu0 %310 }
  0x8c   : > { %v325_v28 = vmul.f32 %v311_v27, %v293_v24  ;;  %v326_v29 = vmul.f32 %v311_v27, %v294_v25  ;;  %v364_v40 = vmax.f32 %v356_v31, 0.0  ;;  %v363_v42 = vmax.f32 %v355_v30, 0.0 }
  0x8e   : > { %v357_v32 = vadd.f32 %v343_v26, %v325_v28  ;;  %v358_v33 = vadd.f32 %v343_v26, %v326_v29 }
  0x8f   : > { %v321_v35 = vpop.permute.xlu1 %320  ;;  %v316_v37 = vpop.permute.xlu0 %315 }
  0x90   : > { %v366_v41 = vmax.f32 %v358_v33, 0.0  ;;  %v365_v43 = vmax.f32 %v357_v32, 0.0  ;;  %v329_v44 = vmul.f32 %v321_v35, %v297_v34  ;;  %v330_v45 = vmul.f32 %v321_v35, %v298_v36 }
  0x91   : > { %v327_v46 = vmul.f32 %v316_v37, %v295_v38  ;;  %v328_v47 = vmul.f32 %v316_v37, %v296_v39 }
  0x92   : > { %v653_v50 = vpack.c.bf16 %v366_v41, %v364_v40  ;;  %v655_v51 = vpack.c.bf16 %v365_v43, %v363_v42 }
  0x93   : > { %v353_v48 = vpop.permute.xlu1 %352  ;;  %v348_v49 = vpop.permute.xlu0 %347 }
  0x94   : > { %v361_v52 = vadd.f32 %v353_v48, %v329_v44  ;;  %v362_v53 = vadd.f32 %v353_v48, %v330_v45  ;;  %v359_v54 = vadd.f32 %v348_v49, %v327_v46  ;;  %v360_v55 = vadd.f32 %v348_v49, %v328_v47  ;;  %654 = vmatprep.subr.bf16.mxu0 %v653_v50 }
  0x95   : > { %661 = vmatprep.subr.bf16.mxu1 %v653_v50  ;;  %656 = vmatpush1.bf16.msra.mxu0 %v655_v51 }
  0x96   : > { %v369_v56 = vmax.f32 %v361_v52, 0.0  ;;  %v370_v57 = vmax.f32 %v362_v53, 0.0  ;;  %v367_v58 = vmax.f32 %v359_v54, 0.0  ;;  %v368_v59 = vmax.f32 %v360_v55, 0.0  ;;  %663 = vmatpush1.bf16.msra.mxu1 %v655_v51 }
  0x97   : > { %v484_v2 = vpop.permute.xlu0 %483  ;;  %v489_v3 = vpop.permute.xlu1 %488 }
  0x98   : > { %v657_v60 = vpack.c.bf16 %v370_v57, %v368_v59  ;;  %v659_v61 = vpack.c.bf16 %v369_v56, %v367_v58 }
  0x9a   : > { %658 = vmatprep.subr.bf16.mxu0 %v657_v60  ;;  %662 = vmatprep.subr.bf16.mxu1 %v657_v60 }
  0x9b   : > { %660 = vmatpush1.bf16.msra.mxu0 %v659_v61  ;;  %664 = vmatpush1.bf16.msra.mxu1 %v659_v61  ;;  %v494_v4 = vpop.permute.xlu0 %493  ;;  %v499_v5 = vpop.permute.xlu1 %498 }
  0x9e   : > { %645 = vmatmul.mubr.msk.f32.vlgmr.msra.gmra.mrb[0].mxu0 %vm375_vm0, %v371_v62  ;;  %647 = vmatmul.mubr.msk.f32.vlgmr.msra.gmra.mrb[0].mxu1 %vm375_vm0, %v373_v63 }
  0x9f   : > { %458 = vmatprep.mubr.f32.mxu0 %v718_v15  ;;  %470 = vmatprep.mubr.f32.mxu1 %v718_v15  ;;  %v516_v6 = vpop.permute.xlu0 %515  ;;  %v521_v7 = vpop.permute.xlu1 %520 }
  0xa2   : > { %646 = vmatmul.mubr.msk.f32.gmra.mrb[2].mxu0 %vm375_vm0, %v372_v0  ;;  %648 = vmatmul.mubr.msk.f32.gmra.mrb[2].mxu1 %vm375_vm0, %v374_v1 }
  0xa3   : > { %v526_v14 = vpop.permute.xlu0 %525  ;;  %v531_v27 = vpop.permute.xlu1 %530 }
 0x171   : > { %v454_v8 = vpop.f32.mrb[0].mxu0  ;;  %v466_v9 = vpop.f32.mrb[0].mxu1 }
 0x172   : > { %v501_v10 = vmul.f32 %v484_v2, %v454_v8  ;;  %v505_v11 = vmul.f32 %v494_v4, %v466_v9  ;;  %v456_v12 = vpop.f32.mrb[1].mxu0  ;;  %v468_v13 = vpop.f32.mrb[1].mxu1 }
 0x173   : > { %v502_v15 = vmul.f32 %v484_v2, %v456_v12  ;;  %v506_v16 = vmul.f32 %v494_v4, %v468_v13 }
 0x174   : > { %v533_v17 = vadd.f32 %v516_v6, %v501_v10  ;;  %v537_v18 = vadd.f32 %v526_v14, %v505_v11 }
 0x175   : > { %v534_v19 = vadd.f32 %v516_v6, %v502_v15  ;;  %v538_v20 = vadd.f32 %v526_v14, %v506_v16  ;;  %v460_v21 = vpop.f32.mrb[2].mxu0  ;;  %v472_v22 = vpop.f32.mrb[2].mxu1 }
 0x176   : > { %541 = vst [vmem:[%s289_s7] sm:$0xff] %v533_v17  ;;  %545 = vst [vmem:[%s289_s7 + $0x20] sm:$0xff] %v537_v18  ;;  %v503_v23 = vmul.f32 %v489_v3, %v460_v21  ;;  %v507_v24 = vmul.f32 %v499_v5, %v472_v22  ;;  %v462_v25 = vpop.f32.mrb[3].mxu0  ;;  %v474_v26 = vpop.f32.mrb[3].mxu1 }
 0x177   : > { %542 = vst [vmem:[%s289_s7 + $0x8] sm:$0xff] %v534_v19  ;;  %546 = vst [vmem:[%s289_s7 + $0x28] sm:$0xff] %v538_v20  ;;  %v504_v28 = vmul.f32 %v489_v3, %v462_v25  ;;  %v508_v29 = vmul.f32 %v499_v5, %v474_v26 }
 0x178   : > { %v535_v30 = vadd.f32 %v521_v7, %v503_v23  ;;  %v539_v31 = vadd.f32 %v531_v27, %v507_v24 }
 0x179   : > { %v536_v32 = vadd.f32 %v521_v7, %v504_v28  ;;  %v540_v33 = vadd.f32 %v531_v27, %v508_v29 }
 0x17a   : > { %543 = vst [vmem:[%s289_s7 + $0x10] sm:$0xff] %v535_v30  ;;  %547 = vst [vmem:[%s289_s7 + $0x30] sm:$0xff] %v539_v31 }
 0x17b   : > { %544 = vst [vmem:[%s289_s7 + $0x18] sm:$0xff] %v536_v32  ;;  %548 = vst [vmem:[%s289_s7 + $0x38] sm:$0xff] %v540_v33 }
 0x17c PF: > { %s16_s23 = sadd.s32 1, %s715_s23   ;;  %s869_s21 = smov %s711_s22 }
 0x17d   : > { %p13_p5 = scmp.ge.s32.totalorder %s16_s23, 4   ;;  %s870_s22 = smov %s872_s24 }
 0x17f   :  { %15 = sbr.rel (!%p13_p5) target bundleno = 2 (0x2), region = 74 }

</bundles_post_ra>
